<compile_context>
chip_gen: v5e
topology: v5e:2x2
jax: 0.10.0
libtpu: 0.0.40
codegen_flags: <defaults>
</compile_context>

<pallas_src>
import jax
import jax.numpy as jnp
from jax.experimental import pallas as pl
from jax.experimental.pallas import tpu as pltpu


# ---------------------------------------------------------------------------
# Fused per-layer kernel (iterated `layers` times via the grid)
# ---------------------------------------------------------------------------
def _hyperconv_kernel(
    # inputs -----------------------------------------------------------------
    adj_ref, adj_pv_ref, adj_vp_ref, adj_pc_ref, adj_cp_ref, adj_cv_ref,
    adj_vc_ref,
    emb0_ref, pri0_ref, cate0_ref,
    mat_pv_ref, mat_pc_ref, mat_cp_ref, mat_cv_ref,
    wi_ref, bi_ref, wp_ref, bp_ref, wc_ref, bc_ref,
    # outputs ----------------------------------------------------------------
    item_out_ref, price_out_ref,
    # scratch (persists across grid iterations) -------------------------------
    emb_s, pri_s, cate_s,
):
    layer = pl.program_id(0)

    # Seed the layer-carried state from the initial embeddings on step 0.
    @pl.when(layer == 0)
    def _():
        emb_s[...] = emb0_ref[...]
        pri_s[...] = pri0_ref[...]
        cate_s[...] = cate0_ref[...]

    emb = emb_s[...]        # (N, D) item embeddings
    pri = pri_s[...]        # (P, D) price embeddings
    cate = cate_s[...]      # (C, D) category embeddings

    def spmm(adj, x):
        # torch.sparse.mm(adjacency, x), densified.
        return jnp.dot(adj, x, preferred_element_type=jnp.float32)

    def intra_gate(adj, matv, emb2):
        # Original: alpha = (mat_v expanded to (R,D)) @ emb2.T
        # Exact rewrite: alpha[r,c] = mat_v[r] * sum_d emb2[c,d]
        s_row = jnp.sum(emb2, axis=1)[None, :]                 # (1, C)
        alpha = matv * s_row                                   # (R, C)
        # softmax over dim=1 (max-stabilized)
        m = jnp.max(alpha, axis=1, keepdims=True)
        e = jnp.exp(alpha - m)
        alpha = e / jnp.sum(e, axis=1, keepdims=True)
        # mask by adjacency and re-normalize rows
        alpha = alpha * adj
        denom = jnp.sum(alpha, axis=1, keepdims=True) + 1e-8
        alpha = alpha / denom
        return jnp.dot(alpha, emb2, preferred_element_type=jnp.float32)
        # TODO(synk): nn.Dropout(0.7) omitted — identity in eval/inference mode.

    def inter_gate(e1, e2, e3, w_fused, b_fused):
        # gate = sigmoid([e1|e2|e3] @ W_fused + b_fused), weights pre-folded on
        # host so the five original matmuls collapse to one K=3D MXU push.
        x = jnp.concatenate([e1, e2, e3], axis=1)              # (N, 3D)
        pre = jnp.dot(x, w_fused, preferred_element_type=jnp.float32) + b_fused
        gate = jax.nn.sigmoid(pre)
        return e1 + gate * e2 + (1.0 - gate) * e3
        # TODO(synk): nn.Dropout(0.5) omitted — identity in eval/inference mode.

    item = inter_gate(emb,
                      spmm(adj_vp_ref[...], pri),
                      spmm(adj_vc_ref[...], cate),
                      wi_ref[...], bi_ref[...]) + spmm(adj_ref[...], emb)

    price = inter_gate(pri,
                       intra_gate(adj_pv_ref[...], mat_pv_ref[...], emb),
                       intra_gate(adj_pc_ref[...], mat_pc_ref[...], cate),
                       wp_ref[...], bp_ref[...])

    cate_new = inter_gate(cate,
                          intra_gate(adj_cp_ref[...], mat_cp_ref[...], pri),
                          intra_gate(adj_cv_ref[...], mat_cv_ref[...], emb),
                          wc_ref[...], bc_ref[...])

    # Carry state to the next layer.
    emb_s[...] = item
    pri_s[...] = price
    cate_s[...] = cate_new

    # Output blocks are VMEM-resident across the grid axis; the last layer's
    # values are what gets written back to HBM.
    item_out_ref[...] = item
    price_out_ref[...] = price


# ---------------------------------------------------------------------------
# Host wrapper: weight folding + single pallas_call
# ---------------------------------------------------------------------------
def hyperconv_forward(params, layers,
                      adjacency, adj_pv, adj_vp, adj_pc, adj_cp, adj_cv, adj_vc,
                      embedding, pri_emb, cate_emb):
    assert layers >= 1
    N, D = embedding.shape
    P = pri_emb.shape[0]
    C = cate_emb.shape[0]

    def fold(a_o_g, b_o_g1, b_o_g2):
        # concat(e1,e2,e3)@Wa + ba + e2@W1 + b1 + e3@W2 + b2
        #   == concat(e1,e2,e3) @ [Wa1; Wa2+W1; Wa3+W2] + (ba+b1+b2)
        Wa, ba = a_o_g
        W1, b1 = b_o_g1
        W2, b2 = b_o_g2
        W = jnp.concatenate([Wa[:D], Wa[D:2 * D] + W1, Wa[2 * D:] + W2], axis=0)
        b = ba + b1 + b2
        return W, b

    Wi, bi = fold(params['a_o_g_i'], params['b_o_gi1'], params['b_o_gi2'])
    Wp, bp = fold(params['a_o_g_p'], params['b_o_gp1'], params['b_o_gp2'])
    Wc, bc = fold(params['a_o_g_c'], params['b_o_gc1'], params['b_o_gc2'])

    inputs = (adjacency, adj_pv, adj_vp, adj_pc, adj_cp, adj_cv, adj_vc,
              embedding, pri_emb, cate_emb,
              params['mat_pv'], params['mat_pc'], params['mat_cp'],
              params['mat_cv'],
              Wi, bi, Wp, bp, Wc, bc)

    def full_spec(arr):
        nd = arr.ndim
        # Whole-array VMEM block, constant across the layer axis (fetched once).
        return pl.BlockSpec(arr.shape, lambda l, _nd=nd: (0,) * _nd)

    grid_spec = pltpu.PrefetchScalarGridSpec(
        num_scalar_prefetch=0,
        grid=(layers,),
        in_specs=[full_spec(x) for x in inputs],
        out_specs=[pl.BlockSpec((N, D), lambda l: (0, 0)),
                   pl.BlockSpec((P, D), lambda l: (0, 0))],
        scratch_shapes=[pltpu.VMEM((N, D), jnp.float32),
                        pltpu.VMEM((P, D), jnp.float32),
                        pltpu.VMEM((C, D), jnp.float32)],
    )

    item, price = pl.pallas_call(
        _hyperconv_kernel,
        out_shape=(jax.ShapeDtypeStruct((N, D), jnp.float32),
                   jax.ShapeDtypeStruct((P, D), jnp.float32)),
        grid_spec=grid_spec,
        compiler_params=pltpu.CompilerParams(
            dimension_semantics=("arbitrary",)),
    )(*inputs)
    return item, price


# ---------------------------------------------------------------------------
# Pure-JAX reference (mirrors the PyTorch module exactly, unfused math)
# ---------------------------------------------------------------------------
def reference_forward(params, layers,
                      adjacency, adj_pv, adj_vp, adj_pc, adj_cp, adj_cv, adj_vc,
                      embedding, pri_emb, cate_emb):
    D = embedding.shape[1]

    def get_emb(adj, emb):
        return adj @ emb

    def intra(adj, matv, emb2):
        matv_e = jnp.broadcast_to(matv, (matv.shape[0], D))
        alpha = matv_e @ emb2.T
        alpha = jax.nn.softmax(alpha, axis=1)
        alpha = alpha * adj
        denom = jnp.sum(alpha, axis=1, keepdims=True) + 1e-8
        return (alpha / denom) @ emb2

    def inter(a_o_g, b_o_g1, b_o_g2, e1, e2, e3):
        Wa, ba = a_o_g
        W1, b1 = b_o_g1
        W2, b2 = b_o_g2
        pre = (jnp.concatenate([e1, e2, e3], axis=1) @ Wa + ba
               + e2 @ W1 + b1 + e3 @ W2 + b2)
        g = jax.nn.sigmoid(pre)
        return e1 + g * e2 + (1.0 - g) * e3

    item = price = None
    for _ in range(layers):
        item = inter(params['a_o_g_i'], params['b_o_gi1'], params['b_o_gi2'],
                     embedding, get_emb(adj_vp, pri_emb),
                     get_emb(adj_vc, cate_emb)) + get_emb(adjacency, embedding)
        price = inter(params['a_o_g_p'], params['b_o_gp1'], params['b_o_gp2'],
                      pri_emb, intra(adj_pv, params['mat_pv'], embedding),
                      intra(adj_pc, params['mat_pc'], cate_emb))
        cate = inter(params['a_o_g_c'], params['b_o_gc1'], params['b_o_gc2'],
                     cate_emb, intra(adj_cp, params['mat_cp'], pri_emb),
                     intra(adj_cv, params['mat_cv'], embedding))
        embedding, pri_emb, cate_emb = item, price, cate
    return item, price


# ---------------------------------------------------------------------------
# Deterministic parameter / input construction
# ---------------------------------------------------------------------------
def init_params(key, emb_size, n_node, n_price, n_category):
    D = emb_size
    keys = jax.random.split(key, 13)

    def linear(k, in_dim, out_dim):
        kw, kb = jax.random.split(k)
        bound = 1.0 / (in_dim ** 0.5)
        W = jax.random.uniform(kw, (in_dim, out_dim), jnp.float32, -bound, bound)
        b = jax.random.uniform(kb, (1, out_dim), jnp.float32, -bound, bound)
        return (W, b)

    return {
        'mat_cp': jax.random.normal(keys[0], (n_category, 1), jnp.float32) * 0.1,
        'mat_pc': jax.random.normal(keys[1], (n_price, 1), jnp.float32) * 0.1,
        'mat_pv': jax.random.normal(keys[2], (n_price, 1), jnp.float32) * 0.1,
        'mat_cv': jax.random.normal(keys[3], (n_category, 1), jnp.float32) * 0.1,
        'a_o_g_i': linear(keys[4], 3 * D, D),
        'b_o_gi1': linear(keys[5], D, D),
        'b_o_gi2': linear(keys[6], D, D),
        'a_o_g_p': linear(keys[7], 3 * D, D),
        'b_o_gp1': linear(keys[8], D, D),
        'b_o_gp2': linear(keys[9], D, D),
        'a_o_g_c': linear(keys[10], 3 * D, D),
        'b_o_gc1': linear(keys[11], D, D),
        'b_o_gc2': linear(keys[12], D, D),
    }


def make_adj(key, rows, cols, density=0.4):
    kv, km = jax.random.split(key)
    vals = jax.random.uniform(kv, (rows, cols), jnp.float32)
    mask = (jax.random.uniform(km, (rows, cols)) < density).astype(jnp.float32)
    return vals * mask


if __name__ == "__main__":
    emb_size = 32
    n_node, n_price, n_category = 16, 8, 8
    layers = 2

    key = jax.random.PRNGKey(0)
    k_par, k_adj, k_emb = jax.random.split(key, 3)
    params = init_params(k_par, emb_size, n_node, n_price, n_category)

    ka = jax.random.split(k_adj, 7)
    adjacency = make_adj(ka[0], n_node, n_node)          # item-item
    adj_pv = make_adj(ka[1], n_price, n_node)            # price -> item
    adj_vp = make_adj(ka[2], n_node, n_price)            # item  -> price
    adj_pc = make_adj(ka[3], n_price, n_category)        # price -> category
    adj_cp = make_adj(ka[4], n_category, n_price)        # category -> price
    adj_cv = make_adj(ka[5], n_category, n_node)         # category -> item
    adj_vc = make_adj(ka[6], n_node, n_category)         # item  -> category

    ke = jax.random.split(k_emb, 3)
    embedding = jax.random.normal(ke[0], (n_node, emb_size), jnp.float32)
    pri_emb = jax.random.normal(ke[1], (n_price, emb_size), jnp.float32)
    cate_emb = jax.random.normal(ke[2], (n_category, emb_size), jnp.float32)

    fwd = jax.jit(hyperconv_forward, static_argnames=("layers",))
    item_out, price_out = fwd(
        params, layers,
        adjacency, adj_pv, adj_vp, adj_pc, adj_cp, adj_cv, adj_vc,
        embedding, pri_emb, cate_emb)
    jax.block_until_ready((item_out, price_out))

    assert item_out.shape == (n_node, emb_size)
    assert price_out.shape == (n_price, emb_size)

    # Correctness check against the unfused pure-JAX reference.
    ref_item, ref_price = reference_forward(
        params, layers,
        adjacency, adj_pv, adj_vp, adj_pc, adj_cp, adj_cv, adj_vc,
        embedding, pri_emb, cate_emb)
    assert bool(jnp.allclose(item_out, ref_item, atol=1e-3, rtol=1e-3))
    assert bool(jnp.allclose(price_out, ref_price, atol=1e-3, rtol=1e-3))

    print("KERNEL_OK")
</pallas_src>

<mosaic_0001>
module attributes {stable_mosaic.version = 11 : i64} {
  func.func @_hyperconv_kernel(%arg0: i32, %arg1: memref<16x16xf32, #tpu.memory_space<vmem>>, %arg2: memref<8x16xf32, #tpu.memory_space<vmem>>, %arg3: memref<16x8xf32, #tpu.memory_space<vmem>>, %arg4: memref<8x8xf32, #tpu.memory_space<vmem>>, %arg5: memref<8x8xf32, #tpu.memory_space<vmem>>, %arg6: memref<8x16xf32, #tpu.memory_space<vmem>>, %arg7: memref<16x8xf32, #tpu.memory_space<vmem>>, %arg8: memref<16x32xf32, #tpu.memory_space<vmem>>, %arg9: memref<8x32xf32, #tpu.memory_space<vmem>>, %arg10: memref<8x32xf32, #tpu.memory_space<vmem>>, %arg11: memref<8x1xf32, #tpu.memory_space<vmem>>, %arg12: memref<8x1xf32, #tpu.memory_space<vmem>>, %arg13: memref<8x1xf32, #tpu.memory_space<vmem>>, %arg14: memref<8x1xf32, #tpu.memory_space<vmem>>, %arg15: memref<96x32xf32, #tpu.memory_space<vmem>>, %arg16: memref<1x32xf32, #tpu.memory_space<vmem>>, %arg17: memref<96x32xf32, #tpu.memory_space<vmem>>, %arg18: memref<1x32xf32, #tpu.memory_space<vmem>>, %arg19: memref<96x32xf32, #tpu.memory_space<vmem>>, %arg20: memref<1x32xf32, #tpu.memory_space<vmem>>, %arg21: memref<16x32xf32, #tpu.memory_space<vmem>>, %arg22: memref<8x32xf32, #tpu.memory_space<vmem>>, %arg23: memref<16x32xf32, #tpu.memory_space<vmem>>, %arg24: memref<8x32xf32, #tpu.memory_space<vmem>>, %arg25: memref<8x32xf32, #tpu.memory_space<vmem>>) attributes {dimension_semantics = [#tpu.dimension_semantics<arbitrary>], iteration_bounds = array<i64: 2>, scalar_prefetch = 0 : i64, scratch_operands = 3 : i64, tpu.core_type = #tpu.core_type<tc>, window_params = [{pipeline_mode = #tpu.pipeline_mode<synchronous>, transform_indices = @transform_0, window_bounds = array<i64: 16, 16>}, {pipeline_mode = #tpu.pipeline_mode<synchronous>, transform_indices = @transform_1, window_bounds = array<i64: 8, 16>}, {pipeline_mode = #tpu.pipeline_mode<synchronous>, transform_indices = @transform_2, window_bounds = array<i64: 16, 8>}, {pipeline_mode = #tpu.pipeline_mode<synchronous>, transform_indices = @transform_3, window_bounds = array<i64: 8, 8>}, {pipeline_mode = #tpu.pipeline_mode<synchronous>, transform_indices = @transform_4, window_bounds = array<i64: 8, 8>}, {pipeline_mode = #tpu.pipeline_mode<synchronous>, transform_indices = @transform_5, window_bounds = array<i64: 8, 16>}, {pipeline_mode = #tpu.pipeline_mode<synchronous>, transform_indices = @transform_6, window_bounds = array<i64: 16, 8>}, {pipeline_mode = #tpu.pipeline_mode<synchronous>, transform_indices = @transform_7, window_bounds = array<i64: 16, 32>}, {pipeline_mode = #tpu.pipeline_mode<synchronous>, transform_indices = @transform_8, window_bounds = array<i64: 8, 32>}, {pipeline_mode = #tpu.pipeline_mode<synchronous>, transform_indices = @transform_9, window_bounds = array<i64: 8, 32>}, {pipeline_mode = #tpu.pipeline_mode<synchronous>, transform_indices = @transform_10, window_bounds = array<i64: 8, 1>}, {pipeline_mode = #tpu.pipeline_mode<synchronous>, transform_indices = @transform_11, window_bounds = array<i64: 8, 1>}, {pipeline_mode = #tpu.pipeline_mode<synchronous>, transform_indices = @transform_12, window_bounds = array<i64: 8, 1>}, {pipeline_mode = #tpu.pipeline_mode<synchronous>, transform_indices = @transform_13, window_bounds = array<i64: 8, 1>}, {pipeline_mode = #tpu.pipeline_mode<synchronous>, transform_indices = @transform_14, window_bounds = array<i64: 96, 32>}, {pipeline_mode = #tpu.pipeline_mode<synchronous>, transform_indices = @transform_15, window_bounds = array<i64: 1, 32>}, {pipeline_mode = #tpu.pipeline_mode<synchronous>, transform_indices = @transform_16, window_bounds = array<i64: 96, 32>}, {pipeline_mode = #tpu.pipeline_mode<synchronous>, transform_indices = @transform_17, window_bounds = array<i64: 1, 32>}, {pipeline_mode = #tpu.pipeline_mode<synchronous>, transform_indices = @transform_18, window_bounds = array<i64: 96, 32>}, {pipeline_mode = #tpu.pipeline_mode<synchronous>, transform_indices = @transform_19, window_bounds = array<i64: 1, 32>}, {pipeline_mode = #tpu.pipeline_mode<synchronous>, transform_indices = @transform_20, window_bounds = array<i64: 16, 32>}, {pipeline_mode = #tpu.pipeline_mode<synchronous>, transform_indices = @transform_21, window_bounds = array<i64: 8, 32>}]} {
    %c0_i32 = arith.constant 0 : i32
    %0 = arith.cmpi eq, %arg0, %c0_i32 : i32
    %1 = arith.extui %0 : i1 to i32
    %c0_i32_0 = arith.constant 0 : i32
    %2 = arith.cmpi ne, %1, %c0_i32_0 : i32
    scf.if %2 {
      %c0_85 = arith.constant 0 : index
      %c0_86 = arith.constant 0 : index
      %165 = vector.load %arg8[%c0_85, %c0_86] : memref<16x32xf32, #tpu.memory_space<vmem>>, vector<16x32xf32>
      %c0_87 = arith.constant 0 : index
      %c0_88 = arith.constant 0 : index
      %166 = vector.load %arg23[%c0_87, %c0_88] : memref<16x32xf32, #tpu.memory_space<vmem>>, vector<16x32xf32>
      tpu.vector_store %arg23[%c0_87, %c0_88], %165 {strides = array<i32>} : memref<16x32xf32, #tpu.memory_space<vmem>>, vector<16x32xf32>,
      %c0_89 = arith.constant 0 : index
      %c0_90 = arith.constant 0 : index
      %167 = vector.load %arg9[%c0_89, %c0_90] : memref<8x32xf32, #tpu.memory_space<vmem>>, vector<8x32xf32>
      %c0_91 = arith.constant 0 : index
      %c0_92 = arith.constant 0 : index
      %168 = vector.load %arg24[%c0_91, %c0_92] : memref<8x32xf32, #tpu.memory_space<vmem>>, vector<8x32xf32>
      tpu.vector_store %arg24[%c0_91, %c0_92], %167 {strides = array<i32>} : memref<8x32xf32, #tpu.memory_space<vmem>>, vector<8x32xf32>,
      %c0_93 = arith.constant 0 : index
      %c0_94 = arith.constant 0 : index
      %169 = vector.load %arg10[%c0_93, %c0_94] : memref<8x32xf32, #tpu.memory_space<vmem>>, vector<8x32xf32>
      %c0_95 = arith.constant 0 : index
      %c0_96 = arith.constant 0 : index
      %170 = vector.load %arg25[%c0_95, %c0_96] : memref<8x32xf32, #tpu.memory_space<vmem>>, vector<8x32xf32>
      tpu.vector_store %arg25[%c0_95, %c0_96], %169 {strides = array<i32>} : memref<8x32xf32, #tpu.memory_space<vmem>>, vector<8x32xf32>,
    } else {
    }
    %c0 = arith.constant 0 : index
    %c0_1 = arith.constant 0 : index
    %3 = vector.load %arg23[%c0, %c0_1] : memref<16x32xf32, #tpu.memory_space<vmem>>, vector<16x32xf32>
    %c0_2 = arith.constant 0 : index
    %c0_3 = arith.constant 0 : index
    %4 = vector.load %arg24[%c0_2, %c0_3] : memref<8x32xf32, #tpu.memory_space<vmem>>, vector<8x32xf32>
    %c0_4 = arith.constant 0 : index
    %c0_5 = arith.constant 0 : index
    %5 = vector.load %arg25[%c0_4, %c0_5] : memref<8x32xf32, #tpu.memory_space<vmem>>, vector<8x32xf32>
    %c0_6 = arith.constant 0 : index
    %c0_7 = arith.constant 0 : index
    %6 = vector.load %arg3[%c0_6, %c0_7] : memref<16x8xf32, #tpu.memory_space<vmem>>, vector<16x8xf32>
    %cst = arith.constant dense<0.000000e+00> : vector<16x32xf32>
    %7 = tpu.matmul %6, %4, %cst {dimension_numbers = #tpu.dot_dimension_numbers<[1], [0], [0], [1], [0, 0, 1, 1], [], []>} : vector<16x8xf32>, vector<8x32xf32>, vector<16x32xf32> -> vector<16x32xf32>
    %c0_8 = arith.constant 0 : index
    %c0_9 = arith.constant 0 : index
    %8 = vector.load %arg7[%c0_8, %c0_9] : memref<16x8xf32, #tpu.memory_space<vmem>>, vector<16x8xf32>
    %cst_10 = arith.constant dense<0.000000e+00> : vector<16x32xf32>
    %9 = tpu.matmul %8, %5, %cst_10 {dimension_numbers = #tpu.dot_dimension_numbers<[1], [0], [0], [1], [0, 0, 1, 1], [], []>} : vector<16x8xf32>, vector<8x32xf32>, vector<16x32xf32> -> vector<16x32xf32>
    %c0_11 = arith.constant 0 : index
    %c0_12 = arith.constant 0 : index
    %10 = vector.load %arg15[%c0_11, %c0_12] : memref<96x32xf32, #tpu.memory_space<vmem>>, vector<96x32xf32>
    %c0_13 = arith.constant 0 : index
    %c0_14 = arith.constant 0 : index
    %11 = vector.load %arg16[%c0_13, %c0_14] : memref<1x32xf32, #tpu.memory_space<vmem>>, vector<1x32xf32>
    %12 = tpu.concatenate %3, %7, %9 in 1 : vector<16x32xf32>, vector<16x32xf32>, vector<16x32xf32> -> vector<16x96xf32>
    %cst_15 = arith.constant dense<0.000000e+00> : vector<16x32xf32>
    %13 = tpu.matmul %12, %10, %cst_15 {dimension_numbers = #tpu.dot_dimension_numbers<[1], [0], [0], [1], [0, 0, 1, 1], [], []>} : vector<16x96xf32>, vector<96x32xf32>, vector<16x32xf32> -> vector<16x32xf32>
    %14 = vector.broadcast %11 : vector<1x32xf32> to vector<16x32xf32>
    %15 = arith.addf %13, %14 : vector<16x32xf32>
    %16 = arith.negf %15 : vector<16x32xf32>
    %17 = math.exp %16 : vector<16x32xf32>
    %cst_16 = arith.constant 1.000000e+00 : f32
    %18 = vector.broadcast %cst_16 : f32 to vector<16x32xf32>
    %19 = arith.addf %18, %17 : vector<16x32xf32>
    %20 = arith.divf %18, %19 : vector<16x32xf32>
    %21 = arith.mulf %20, %7 : vector<16x32xf32>
    %22 = arith.addf %3, %21 : vector<16x32xf32>
    %cst_17 = arith.constant 1.000000e+00 : f32
    %23 = vector.broadcast %cst_17 : f32 to vector<16x32xf32>
    %24 = arith.subf %23, %20 : vector<16x32xf32>
    %25 = arith.mulf %24, %9 : vector<16x32xf32>
    %26 = arith.addf %22, %25 : vector<16x32xf32>
    %c0_18 = arith.constant 0 : index
    %c0_19 = arith.constant 0 : index
    %27 = vector.load %arg1[%c0_18, %c0_19] : memref<16x16xf32, #tpu.memory_space<vmem>>, vector<16x16xf32>
    %cst_20 = arith.constant dense<0.000000e+00> : vector<16x32xf32>
    %28 = tpu.matmul %27, %3, %cst_20 {dimension_numbers = #tpu.dot_dimension_numbers<[1], [0], [0], [1], [0, 0, 1, 1], [], []>} : vector<16x16xf32>, vector<16x32xf32>, vector<16x32xf32> -> vector<16x32xf32>
    %29 = arith.addf %26, %28 : vector<16x32xf32>
    %c0_21 = arith.constant 0 : index
    %c0_22 = arith.constant 0 : index
    %30 = vector.load %arg2[%c0_21, %c0_22] : memref<8x16xf32, #tpu.memory_space<vmem>>, vector<8x16xf32>
    %c0_23 = arith.constant 0 : index
    %c0_24 = arith.constant 0 : index
    %31 = vector.load %arg11[%c0_23, %c0_24] : memref<8x1xf32, #tpu.memory_space<vmem>>, vector<8x1xf32>
    %cst_25 = arith.constant dense<0.000000e+00> : vector<16xf32>
    %32 = vector.multi_reduction <add>, %3, %cst_25 [1] : vector<16x32xf32> to vector<16xf32>
    %33 = vector.shape_cast %32 : vector<16xf32> to vector<1x16xf32>
    %34 = vector.broadcast %31 : vector<8x1xf32> to vector<8x16xf32>
    %35 = vector.broadcast %33 : vector<1x16xf32> to vector<8x16xf32>
    %36 = arith.mulf %34, %35 : vector<8x16xf32>
    %cst_26 = arith.constant dense<0xFF800000> : vector<8xf32>
    %37 = vector.multi_reduction <maximumf>, %36, %cst_26 [1] : vector<8x16xf32> to vector<8xf32>
    %38 = vector.shape_cast %37 : vector<8xf32> to vector<8x1xf32>
    %39 = vector.broadcast %38 : vector<8x1xf32> to vector<8x16xf32>
    %40 = arith.subf %36, %39 : vector<8x16xf32>
    %41 = math.exp %40 : vector<8x16xf32>
    %cst_27 = arith.constant dense<0.000000e+00> : vector<8xf32>
    %42 = vector.multi_reduction <add>, %41, %cst_27 [1] : vector<8x16xf32> to vector<8xf32>
    %43 = vector.shape_cast %42 : vector<8xf32> to vector<8x1xf32>
    %44 = vector.broadcast %43 : vector<8x1xf32> to vector<8x16xf32>
    %45 = arith.divf %41, %44 : vector<8x16xf32>
    %46 = arith.mulf %45, %30 : vector<8x16xf32>
    %cst_28 = arith.constant dense<0.000000e+00> : vector<8xf32>
    %47 = vector.multi_reduction <add>, %46, %cst_28 [1] : vector<8x16xf32> to vector<8xf32>
    %48 = vector.shape_cast %47 : vector<8xf32> to vector<8x1xf32>
    %cst_29 = arith.constant 9.99999993E-9 : f32
    %49 = vector.broadcast %cst_29 : f32 to vector<8x1xf32>
    %50 = arith.addf %48, %49 : vector<8x1xf32>
    %51 = vector.broadcast %50 : vector<8x1xf32> to vector<8x16xf32>
    %52 = arith.divf %46, %51 : vector<8x16xf32>
    %cst_30 = arith.constant dense<0.000000e+00> : vector<8x32xf32>
    %53 = tpu.matmul %52, %3, %cst_30 {dimension_numbers = #tpu.dot_dimension_numbers<[1], [0], [0], [1], [0, 0, 1, 1], [], []>} : vector<8x16xf32>, vector<16x32xf32>, vector<8x32xf32> -> vector<8x32xf32>
    %c0_31 = arith.constant 0 : index
    %c0_32 = arith.constant 0 : index
    %54 = vector.load %arg4[%c0_31, %c0_32] : memref<8x8xf32, #tpu.memory_space<vmem>>, vector<8x8xf32>
    %c0_33 = arith.constant 0 : index
    %c0_34 = arith.constant 0 : index
    %55 = vector.load %arg12[%c0_33, %c0_34] : memref<8x1xf32, #tpu.memory_space<vmem>>, vector<8x1xf32>
    %cst_35 = arith.constant dense<0.000000e+00> : vector<8xf32>
    %56 = vector.multi_reduction <add>, %5, %cst_35 [1] : vector<8x32xf32> to vector<8xf32>
    %57 = vector.shape_cast %56 : vector<8xf32> to vector<1x8xf32>
    %58 = vector.broadcast %55 : vector<8x1xf32> to vector<8x8xf32>
    %59 = vector.broadcast %57 : vector<1x8xf32> to vector<8x8xf32>
    %60 = arith.mulf %58, %59 : vector<8x8xf32>
    %cst_36 = arith.constant dense<0xFF800000> : vector<8xf32>
    %61 = vector.multi_reduction <maximumf>, %60, %cst_36 [1] : vector<8x8xf32> to vector<8xf32>
    %62 = vector.shape_cast %61 : vector<8xf32> to vector<8x1xf32>
    %63 = vector.broadcast %62 : vector<8x1xf32> to vector<8x8xf32>
    %64 = arith.subf %60, %63 : vector<8x8xf32>
    %65 = math.exp %64 : vector<8x8xf32>
    %cst_37 = arith.constant dense<0.000000e+00> : vector<8xf32>
    %66 = vector.multi_reduction <add>, %65, %cst_37 [1] : vector<8x8xf32> to vector<8xf32>
    %67 = vector.shape_cast %66 : vector<8xf32> to vector<8x1xf32>
    %68 = vector.broadcast %67 : vector<8x1xf32> to vector<8x8xf32>
    %69 = arith.divf %65, %68 : vector<8x8xf32>
    %70 = arith.mulf %69, %54 : vector<8x8xf32>
    %cst_38 = arith.constant dense<0.000000e+00> : vector<8xf32>
    %71 = vector.multi_reduction <add>, %70, %cst_38 [1] : vector<8x8xf32> to vector<8xf32>
    %72 = vector.shape_cast %71 : vector<8xf32> to vector<8x1xf32>
    %cst_39 = arith.constant 9.99999993E-9 : f32
    %73 = vector.broadcast %cst_39 : f32 to vector<8x1xf32>
    %74 = arith.addf %72, %73 : vector<8x1xf32>
    %75 = vector.broadcast %74 : vector<8x1xf32> to vector<8x8xf32>
    %76 = arith.divf %70, %75 : vector<8x8xf32>
    %cst_40 = arith.constant dense<0.000000e+00> : vector<8x32xf32>
    %77 = tpu.matmul %76, %5, %cst_40 {dimension_numbers = #tpu.dot_dimension_numbers<[1], [0], [0], [1], [0, 0, 1, 1], [], []>} : vector<8x8xf32>, vector<8x32xf32>, vector<8x32xf32> -> vector<8x32xf32>
    %c0_41 = arith.constant 0 : index
    %c0_42 = arith.constant 0 : index
    %78 = vector.load %arg17[%c0_41, %c0_42] : memref<96x32xf32, #tpu.memory_space<vmem>>, vector<96x32xf32>
    %c0_43 = arith.constant 0 : index
    %c0_44 = arith.constant 0 : index
    %79 = vector.load %arg18[%c0_43, %c0_44] : memref<1x32xf32, #tpu.memory_space<vmem>>, vector<1x32xf32>
    %80 = tpu.concatenate %4, %53, %77 in 1 : vector<8x32xf32>, vector<8x32xf32>, vector<8x32xf32> -> vector<8x96xf32>
    %cst_45 = arith.constant dense<0.000000e+00> : vector<8x32xf32>
    %81 = tpu.matmul %80, %78, %cst_45 {dimension_numbers = #tpu.dot_dimension_numbers<[1], [0], [0], [1], [0, 0, 1, 1], [], []>} : vector<8x96xf32>, vector<96x32xf32>, vector<8x32xf32> -> vector<8x32xf32>
    %82 = vector.broadcast %79 : vector<1x32xf32> to vector<8x32xf32>
    %83 = arith.addf %81, %82 : vector<8x32xf32>
    %84 = arith.negf %83 : vector<8x32xf32>
    %85 = math.exp %84 : vector<8x32xf32>
    %cst_46 = arith.constant 1.000000e+00 : f32
    %86 = vector.broadcast %cst_46 : f32 to vector<8x32xf32>
    %87 = arith.addf %86, %85 : vector<8x32xf32>
    %88 = arith.divf %86, %87 : vector<8x32xf32>
    %89 = arith.mulf %88, %53 : vector<8x32xf32>
    %90 = arith.addf %4, %89 : vector<8x32xf32>
    %cst_47 = arith.constant 1.000000e+00 : f32
    %91 = vector.broadcast %cst_47 : f32 to vector<8x32xf32>
    %92 = arith.subf %91, %88 : vector<8x32xf32>
    %93 = arith.mulf %92, %77 : vector<8x32xf32>
    %94 = arith.addf %90, %93 : vector<8x32xf32>
    %c0_48 = arith.constant 0 : index
    %c0_49 = arith.constant 0 : index
    %95 = vector.load %arg5[%c0_48, %c0_49] : memref<8x8xf32, #tpu.memory_space<vmem>>, vector<8x8xf32>
    %c0_50 = arith.constant 0 : index
    %c0_51 = arith.constant 0 : index
    %96 = vector.load %arg13[%c0_50, %c0_51] : memref<8x1xf32, #tpu.memory_space<vmem>>, vector<8x1xf32>
    %cst_52 = arith.constant dense<0.000000e+00> : vector<8xf32>
    %97 = vector.multi_reduction <add>, %4, %cst_52 [1] : vector<8x32xf32> to vector<8xf32>
    %98 = vector.shape_cast %97 : vector<8xf32> to vector<1x8xf32>
    %99 = vector.broadcast %96 : vector<8x1xf32> to vector<8x8xf32>
    %100 = vector.broadcast %98 : vector<1x8xf32> to vector<8x8xf32>
    %101 = arith.mulf %99, %100 : vector<8x8xf32>
    %cst_53 = arith.constant dense<0xFF800000> : vector<8xf32>
    %102 = vector.multi_reduction <maximumf>, %101, %cst_53 [1] : vector<8x8xf32> to vector<8xf32>
    %103 = vector.shape_cast %102 : vector<8xf32> to vector<8x1xf32>
    %104 = vector.broadcast %103 : vector<8x1xf32> to vector<8x8xf32>
    %105 = arith.subf %101, %104 : vector<8x8xf32>
    %106 = math.exp %105 : vector<8x8xf32>
    %cst_54 = arith.constant dense<0.000000e+00> : vector<8xf32>
    %107 = vector.multi_reduction <add>, %106, %cst_54 [1] : vector<8x8xf32> to vector<8xf32>
    %108 = vector.shape_cast %107 : vector<8xf32> to vector<8x1xf32>
    %109 = vector.broadcast %108 : vector<8x1xf32> to vector<8x8xf32>
    %110 = arith.divf %106, %109 : vector<8x8xf32>
    %111 = arith.mulf %110, %95 : vector<8x8xf32>
    %cst_55 = arith.constant dense<0.000000e+00> : vector<8xf32>
    %112 = vector.multi_reduction <add>, %111, %cst_55 [1] : vector<8x8xf32> to vector<8xf32>
    %113 = vector.shape_cast %112 : vector<8xf32> to vector<8x1xf32>
    %cst_56 = arith.constant 9.99999993E-9 : f32
    %114 = vector.broadcast %cst_56 : f32 to vector<8x1xf32>
    %115 = arith.addf %113, %114 : vector<8x1xf32>
    %116 = vector.broadcast %115 : vector<8x1xf32> to vector<8x8xf32>
    %117 = arith.divf %111, %116 : vector<8x8xf32>
    %cst_57 = arith.constant dense<0.000000e+00> : vector<8x32xf32>
    %118 = tpu.matmul %117, %4, %cst_57 {dimension_numbers = #tpu.dot_dimension_numbers<[1], [0], [0], [1], [0, 0, 1, 1], [], []>} : vector<8x8xf32>, vector<8x32xf32>, vector<8x32xf32> -> vector<8x32xf32>
    %c0_58 = arith.constant 0 : index
    %c0_59 = arith.constant 0 : index
    %119 = vector.load %arg6[%c0_58, %c0_59] : memref<8x16xf32, #tpu.memory_space<vmem>>, vector<8x16xf32>
    %c0_60 = arith.constant 0 : index
    %c0_61 = arith.constant 0 : index
    %120 = vector.load %arg14[%c0_60, %c0_61] : memref<8x1xf32, #tpu.memory_space<vmem>>, vector<8x1xf32>
    %cst_62 = arith.constant dense<0.000000e+00> : vector<16xf32>
    %121 = vector.multi_reduction <add>, %3, %cst_62 [1] : vector<16x32xf32> to vector<16xf32>
    %122 = vector.shape_cast %121 : vector<16xf32> to vector<1x16xf32>
    %123 = vector.broadcast %120 : vector<8x1xf32> to vector<8x16xf32>
    %124 = vector.broadcast %122 : vector<1x16xf32> to vector<8x16xf32>
    %125 = arith.mulf %123, %124 : vector<8x16xf32>
    %cst_63 = arith.constant dense<0xFF800000> : vector<8xf32>
    %126 = vector.multi_reduction <maximumf>, %125, %cst_63 [1] : vector<8x16xf32> to vector<8xf32>
    %127 = vector.shape_cast %126 : vector<8xf32> to vector<8x1xf32>
    %128 = vector.broadcast %127 : vector<8x1xf32> to vector<8x16xf32>
    %129 = arith.subf %125, %128 : vector<8x16xf32>
    %130 = math.exp %129 : vector<8x16xf32>
    %cst_64 = arith.constant dense<0.000000e+00> : vector<8xf32>
    %131 = vector.multi_reduction <add>, %130, %cst_64 [1] : vector<8x16xf32> to vector<8xf32>
    %132 = vector.shape_cast %131 : vector<8xf32> to vector<8x1xf32>
    %133 = vector.broadcast %132 : vector<8x1xf32> to vector<8x16xf32>
    %134 = arith.divf %130, %133 : vector<8x16xf32>
    %135 = arith.mulf %134, %119 : vector<8x16xf32>
    %cst_65 = arith.constant dense<0.000000e+00> : vector<8xf32>
    %136 = vector.multi_reduction <add>, %135, %cst_65 [1] : vector<8x16xf32> to vector<8xf32>
    %137 = vector.shape_cast %136 : vector<8xf32> to vector<8x1xf32>
    %cst_66 = arith.constant 9.99999993E-9 : f32
    %138 = vector.broadcast %cst_66 : f32 to vector<8x1xf32>
    %139 = arith.addf %137, %138 : vector<8x1xf32>
    %140 = vector.broadcast %139 : vector<8x1xf32> to vector<8x16xf32>
    %141 = arith.divf %135, %140 : vector<8x16xf32>
    %cst_67 = arith.constant dense<0.000000e+00> : vector<8x32xf32>
    %142 = tpu.matmul %141, %3, %cst_67 {dimension_numbers = #tpu.dot_dimension_numbers<[1], [0], [0], [1], [0, 0, 1, 1], [], []>} : vector<8x16xf32>, vector<16x32xf32>, vector<8x32xf32> -> vector<8x32xf32>
    %c0_68 = arith.constant 0 : index
    %c0_69 = arith.constant 0 : index
    %143 = vector.load %arg19[%c0_68, %c0_69] : memref<96x32xf32, #tpu.memory_space<vmem>>, vector<96x32xf32>
    %c0_70 = arith.constant 0 : index
    %c0_71 = arith.constant 0 : index
    %144 = vector.load %arg20[%c0_70, %c0_71] : memref<1x32xf32, #tpu.memory_space<vmem>>, vector<1x32xf32>
    %145 = tpu.concatenate %5, %118, %142 in 1 : vector<8x32xf32>, vector<8x32xf32>, vector<8x32xf32> -> vector<8x96xf32>
    %cst_72 = arith.constant dense<0.000000e+00> : vector<8x32xf32>
    %146 = tpu.matmul %145, %143, %cst_72 {dimension_numbers = #tpu.dot_dimension_numbers<[1], [0], [0], [1], [0, 0, 1, 1], [], []>} : vector<8x96xf32>, vector<96x32xf32>, vector<8x32xf32> -> vector<8x32xf32>
    %147 = vector.broadcast %144 : vector<1x32xf32> to vector<8x32xf32>
    %148 = arith.addf %146, %147 : vector<8x32xf32>
    %149 = arith.negf %148 : vector<8x32xf32>
    %150 = math.exp %149 : vector<8x32xf32>
    %cst_73 = arith.constant 1.000000e+00 : f32
    %151 = vector.broadcast %cst_73 : f32 to vector<8x32xf32>
    %152 = arith.addf %151, %150 : vector<8x32xf32>
    %153 = arith.divf %151, %152 : vector<8x32xf32>
    %154 = arith.mulf %153, %118 : vector<8x32xf32>
    %155 = arith.addf %5, %154 : vector<8x32xf32>
    %cst_74 = arith.constant 1.000000e+00 : f32
    %156 = vector.broadcast %cst_74 : f32 to vector<8x32xf32>
    %157 = arith.subf %156, %153 : vector<8x32xf32>
    %158 = arith.mulf %157, %142 : vector<8x32xf32>
    %159 = arith.addf %155, %158 : vector<8x32xf32>
    %c0_75 = arith.constant 0 : index
    %c0_76 = arith.constant 0 : index
    %160 = vector.load %arg23[%c0_75, %c0_76] : memref<16x32xf32, #tpu.memory_space<vmem>>, vector<16x32xf32>
    tpu.vector_store %arg23[%c0_75, %c0_76], %29 {strides = array<i32>} : memref<16x32xf32, #tpu.memory_space<vmem>>, vector<16x32xf32>,
    %c0_77 = arith.constant 0 : index
    %c0_78 = arith.constant 0 : index
    %161 = vector.load %arg24[%c0_77, %c0_78] : memref<8x32xf32, #tpu.memory_space<vmem>>, vector<8x32xf32>
    tpu.vector_store %arg24[%c0_77, %c0_78], %94 {strides = array<i32>} : memref<8x32xf32, #tpu.memory_space<vmem>>, vector<8x32xf32>,
    %c0_79 = arith.constant 0 : index
    %c0_80 = arith.constant 0 : index
    %162 = vector.load %arg25[%c0_79, %c0_80] : memref<8x32xf32, #tpu.memory_space<vmem>>, vector<8x32xf32>
    tpu.vector_store %arg25[%c0_79, %c0_80], %159 {strides = array<i32>} : memref<8x32xf32, #tpu.memory_space<vmem>>, vector<8x32xf32>,
    %c0_81 = arith.constant 0 : index
    %c0_82 = arith.constant 0 : index
    %163 = vector.load %arg21[%c0_81, %c0_82] : memref<16x32xf32, #tpu.memory_space<vmem>>, vector<16x32xf32>
    tpu.vector_store %arg21[%c0_81, %c0_82], %29 {strides = array<i32>} : memref<16x32xf32, #tpu.memory_space<vmem>>, vector<16x32xf32>,
    %c0_83 = arith.constant 0 : index
    %c0_84 = arith.constant 0 : index
    %164 = vector.load %arg22[%c0_83, %c0_84] : memref<8x32xf32, #tpu.memory_space<vmem>>, vector<8x32xf32>
    tpu.vector_store %arg22[%c0_83, %c0_84], %94 {strides = array<i32>} : memref<8x32xf32, #tpu.memory_space<vmem>>, vector<8x32xf32>,
    return
  }
  func.func @transform_0(%arg0: i32) -> (i32, i32) {
    %c0_i32 = arith.constant 0 : i32
    %c0_i32_0 = arith.constant 0 : i32
    %c0_i32_1 = arith.constant 0 : i32
    return %c0_i32, %c0_i32_0 : i32, i32
  }
  func.func @transform_1(%arg0: i32) -> (i32, i32) {
    %c0_i32 = arith.constant 0 : i32
    %c0_i32_0 = arith.constant 0 : i32
    %c0_i32_1 = arith.constant 0 : i32
    return %c0_i32, %c0_i32_0 : i32, i32
  }
  func.func @transform_2(%arg0: i32) -> (i32, i32) {
    %c0_i32 = arith.constant 0 : i32
    %c0_i32_0 = arith.constant 0 : i32
    %c0_i32_1 = arith.constant 0 : i32
    return %c0_i32, %c0_i32_0 : i32, i32
  }
  func.func @transform_3(%arg0: i32) -> (i32, i32) {
    %c0_i32 = arith.constant 0 : i32
    %c0_i32_0 = arith.constant 0 : i32
    %c0_i32_1 = arith.constant 0 : i32
    return %c0_i32, %c0_i32_0 : i32, i32
  }
  func.func @transform_4(%arg0: i32) -> (i32, i32) {
    %c0_i32 = arith.constant 0 : i32
    %c0_i32_0 = arith.constant 0 : i32
    %c0_i32_1 = arith.constant 0 : i32
    return %c0_i32, %c0_i32_0 : i32, i32
  }
  func.func @transform_5(%arg0: i32) -> (i32, i32) {
    %c0_i32 = arith.constant 0 : i32
    %c0_i32_0 = arith.constant 0 : i32
    %c0_i32_1 = arith.constant 0 : i32
    return %c0_i32, %c0_i32_0 : i32, i32
  }
  func.func @transform_6(%arg0: i32) -> (i32, i32) {
    %c0_i32 = arith.constant 0 : i32
    %c0_i32_0 = arith.constant 0 : i32
    %c0_i32_1 = arith.constant 0 : i32
    return %c0_i32, %c0_i32_0 : i32, i32
  }
  func.func @transform_7(%arg0: i32) -> (i32, i32) {
    %c0_i32 = arith.constant 0 : i32
    %c0_i32_0 = arith.constant 0 : i32
    %c0_i32_1 = arith.constant 0 : i32
    return %c0_i32, %c0_i32_0 : i32, i32
  }
  func.func @transform_8(%arg0: i32) -> (i32, i32) {
    %c0_i32 = arith.constant 0 : i32
    %c0_i32_0 = arith.constant 0 : i32
    %c0_i32_1 = arith.constant 0 : i32
    return %c0_i32, %c0_i32_0 : i32, i32
  }
  func.func @transform_9(%arg0: i32) -> (i32, i32) {
    %c0_i32 = arith.constant 0 : i32
    %c0_i32_0 = arith.constant 0 : i32
    %c0_i32_1 = arith.constant 0 : i32
    return %c0_i32, %c0_i32_0 : i32, i32
  }
  func.func @transform_10(%arg0: i32) -> (i32, i32) {
    %c0_i32 = arith.constant 0 : i32
    %c0_i32_0 = arith.constant 0 : i32
    %c0_i32_1 = arith.constant 0 : i32
    return %c0_i32, %c0_i32_0 : i32, i32
  }
  func.func @transform_11(%arg0: i32) -> (i32, i32) {
    %c0_i32 = arith.constant 0 : i32
    %c0_i32_0 = arith.constant 0 : i32
    %c0_i32_1 = arith.constant 0 : i32
    return %c0_i32, %c0_i32_0 : i32, i32
  }
  func.func @transform_12(%arg0: i32) -> (i32, i32) {
    %c0_i32 = arith.constant 0 : i32
    %c0_i32_0 = arith.constant 0 : i32
    %c0_i32_1 = arith.constant 0 : i32
    return %c0_i32, %c0_i32_0 : i32, i32
  }
  func.func @transform_13(%arg0: i32) -> (i32, i32) {
    %c0_i32 = arith.constant 0 : i32
    %c0_i32_0 = arith.constant 0 : i32
    %c0_i32_1 = arith.constant 0 : i32
    return %c0_i32, %c0_i32_0 : i32, i32
  }
  func.func @transform_14(%arg0: i32) -> (i32, i32) {
    %c0_i32 = arith.constant 0 : i32
    %c0_i32_0 = arith.constant 0 : i32
    %c0_i32_1 = arith.constant 0 : i32
    return %c0_i32, %c0_i32_0 : i32, i32
  }
  func.func @transform_15(%arg0: i32) -> (i32, i32) {
    %c0_i32 = arith.constant 0 : i32
    %c0_i32_0 = arith.constant 0 : i32
    %c0_i32_1 = arith.constant 0 : i32
    return %c0_i32, %c0_i32_0 : i32, i32
  }
  func.func @transform_16(%arg0: i32) -> (i32, i32) {
    %c0_i32 = arith.constant 0 : i32
    %c0_i32_0 = arith.constant 0 : i32
    %c0_i32_1 = arith.constant 0 : i32
    return %c0_i32, %c0_i32_0 : i32, i32
  }
  func.func @transform_17(%arg0: i32) -> (i32, i32) {
    %c0_i32 = arith.constant 0 : i32
    %c0_i32_0 = arith.constant 0 : i32
    %c0_i32_1 = arith.constant 0 : i32
    return %c0_i32, %c0_i32_0 : i32, i32
  }
  func.func @transform_18(%arg0: i32) -> (i32, i32) {
    %c0_i32 = arith.constant 0 : i32
    %c0_i32_0 = arith.constant 0 : i32
    %c0_i32_1 = arith.constant 0 : i32
    return %c0_i32, %c0_i32_0 : i32, i32
  }
  func.func @transform_19(%arg0: i32) -> (i32, i32) {
    %c0_i32 = arith.constant 0 : i32
    %c0_i32_0 = arith.constant 0 : i32
    %c0_i32_1 = arith.constant 0 : i32
    return %c0_i32, %c0_i32_0 : i32, i32
  }
  func.func @transform_20(%arg0: i32) -> (i32, i32) {
    %c0_i32 = arith.constant 0 : i32
    %c0_i32_0 = arith.constant 0 : i32
    %c0_i32_1 = arith.constant 0 : i32
    return %c0_i32, %c0_i32_0 : i32, i32
  }
  func.func @transform_21(%arg0: i32) -> (i32, i32) {
    %c0_i32 = arith.constant 0 : i32
    %c0_i32_0 = arith.constant 0 : i32
    %c0_i32_1 = arith.constant 0 : i32
    return %c0_i32, %c0_i32_0 : i32, i32
  }
}

</mosaic_0001>

<bundles_post_ra>
// kernel: hyperconv_forward.1
= control target key start
LH: loop header
LB: loop body
LE: loop exit
PB: predicated region body
PF: predicated region fallthrough
CT: control target
= control target key end

     0   :  { %s2057_s0 = inlined_call_operand.vmem [shape: f32[16,16], index: 0, kind: input, shape index: {}]   ;;  %s2058_s1 = inlined_call_operand.vmem [shape: f32[8,16], index: 1, kind: input, shape index: {}]   ;;  %s2059_s2 = inlined_call_operand.vmem [shape: f32[16,8], index: 2, kind: input, shape index: {}]   ;;  %s2060_s3 = inlined_call_operand.vmem [shape: f32[8,8], index: 3, kind: input, shape index: {}]   ;;  %s2061_s4 = inlined_call_operand.vmem [shape: f32[8,8], index: 4, kind: input, shape index: {}]   ;;  %s2062_s5 = inlined_call_operand.vmem [shape: f32[8,16], index: 5, kind: input, shape index: {}]   ;;  %s2063_s6 = inlined_call_operand.vmem [shape: f32[16,8], index: 6, kind: input, shape index: {}]   ;;  %s2064_s7 = inlined_call_operand.vmem [shape: f32[16,32], index: 7, kind: input, shape index: {}]   ;;  %s2065_s8 = inlined_call_operand.vmem [shape: f32[8,32], index: 8, kind: input, shape index: {}]   ;;  %s2066_s9 = inlined_call_operand.vmem [shape: f32[8,32], index: 9, kind: input, shape index: {}]   ;;  %s2067_s10 = inlined_call_operand.vmem [shape: f32[8,1], index: 10, kind: input, shape index: {}]   ;;  %s2068_s11 = inlined_call_operand.vmem [shape: f32[8,1], index: 11, kind: input, shape index: {}]   ;;  %s2069_s12 = inlined_call_operand.vmem [shape: f32[8,1], index: 12, kind: input, shape index: {}]   ;;  %s2070_s13 = inlined_call_operand.vmem [shape: f32[8,1], index: 13, kind: input, shape index: {}]   ;;  %s2071_s14 = inlined_call_operand.vmem [shape: f32[96,32], index: 14, kind: input, shape index: {}]   ;;  %s2072_s15 = inlined_call_operand.vmem [shape: f32[1,32], index: 15, kind: input, shape index: {}]   ;;  %s2073_s16 = inlined_call_operand.vmem [shape: f32[96,32], index: 16, kind: input, shape index: {}]   ;;  %s2074_s17 = inlined_call_operand.vmem [shape: f32[1,32], index: 17, kind: input, shape index: {}]   ;;  %s2075_s18 = inlined_call_operand.vmem [shape: f32[96,32], index: 18, kind: input, shape index: {}]   ;;  %s2076_s19 = inlined_call_operand.vmem [shape: f32[1,32], index: 19, kind: input, shape index: {}]   ;;  %s2077_s20 = inlined_call_operand.hbm [shape: f32[16,32], index: 20, kind: output, shape index: {0}]   ;;  %s2078_s21 = inlined_call_operand.hbm [shape: f32[8,32], index: 21, kind: output, shape index: {1}]  }
   0x1   :  { %2081 = sst [smem:[#allocation11_spill]] %s2057_s0 }
   0x2   :  { %2082 = sst [smem:[#allocation12_spill]] %s2058_s1 }
   0x3   :  { %2083 = sst [smem:[#allocation13_spill]] %s2059_s2 }
   0x4   :  { %2084 = sst [smem:[#allocation14_spill]] %s2060_s3 }
   0x5   :  { %2085 = sst [smem:[#allocation15_spill]] %s2061_s4 }
   0x6   :  { %2086 = sst [smem:[#allocation16_spill]] %s2062_s5 }
   0x7   :  { %27 = vsyncpa [#allocation6], 0 }
   0x8   :  { %28 = vsyncpa [#allocation8], 0  ;;  %s1709_s2 = smov 0  }
   0x9 LB: > { %s1419_s25 = sadd.s32 4294967295, %s1590_s2   ;;  %p1421_p0 = scmp.ge.s32.totalorder %s1590_s2, 1  ;;  %s1590_s2 = sphi %s1709_s2, %s34_s2  }
   0xa   : > { %p572_p1 = scmp.lt.s32.totalorder %s1590_s2, 3 }
   0xc   : > { %p573_p2 = pnand %p1421_p0, %p572_p1 }
   0xd   : > { %p1422_p3 = scmp.ne.s32.totalorder (!%p573_p2), %s1419_s25, 0 }
   0xe   : > { %576 = sbr.rel (%p573_p2) target bundleno = 1012 (0x3f4), region = 100 }
  0x13   : > { %625 = sbr.rel (%p1422_p3) target bundleno = 29 (0x1d), region = 104 }
  0x18   : > { %v626_v0 = vld [vmem:[%s2064_s7] sm:$0xff]  ;;  %vm628_vm0 = vcmask 261120   ;;  %v627_v1 = vld [vmem:[%s2064_s7 + $0x8] sm:$0xff] }
  0x19   : > { %v631_v2 = vld [vmem:[%s2065_s8] sm:$0xff]  ;;  %629 = vst.msk [vmem:[#allocation2] sm:$0xff] %vm628_vm0, %v626_v0 }
  0x1a   : > { %v633_v3 = vld [vmem:[%s2066_s9] sm:$0xff]  ;;  %630 = vst.msk [vmem:[#allocation2 + $0x8] sm:$0xff] %vm628_vm0, %v627_v1 }
  0x1b   : > { %632 = vst.msk [vmem:[#allocation3] sm:$0xff] %vm628_vm0, %v631_v2 }
  0x1c   : > { %634 = vst.msk [vmem:[#allocation4] sm:$0xff] %vm628_vm0, %v633_v3 }
  0x1d PF: > { %v956_v4 = vld [vmem:[%s2068_s11] sm:$0xff]  ;;  %vm731_vm1 = vcmask 261120   ;;  %v1592_v7 = vmov 0   ;;  %v867_v17 = vlaneseq  ;;  %vm641_vm2 = vcmask 64512   ;;  %s2087_s0 = sld [smem:[#allocation13_spill]]  ;;  %v672_v52 = vld [vmem:[%s2063_s6 + $0x8] sm:$0xff] }
  0x1e   : > { %1475 = vset.pattern.permute.xlu2 %v1592_v7  ;;  %1474 = vset.pattern.permute.xlu1 %v1592_v7  ;;  %v853_v13 = vld [vmem:[%s2067_s10] sm:$0xff]  ;;  %vm872_vm3 = vcmask 130112   ;;  %vm820_vm4 = vcmask 130048   ;;  %s2088_s27 = sld [smem:[#allocation14_spill]]  ;;  %s1593_s22 = smov 32  }
  0x1f   : > { %962 = vperm.xlu2 %1475, %v956_v4   ;;  %1476 = vset.pattern.permute.xlu0 %v1592_v7  ;;  %v1116_v14 = vld [vmem:[%s2069_s12] sm:$0xff]  ;;  %v868_v18 = vand.u32 127, %v867_v17  ;;  %s2089_s29 = sld [smem:[#allocation12_spill]]  ;;  %s1594_s23 = smov 64  }
  0x20   : > { %v1736_v6 = vld [vmem:[#allocation2] sm:$0xff]  ;;  %s2090_s5 = sld [smem:[#allocation16_spill]]  ;;  %p2017_p4 = scmp.eq.s32.totalorder %s1419_s25, 1 }
  0x21   : > { %v854_v9 = vsel %vm731_vm1, %v1736_v6, 0.0  ;;  %v1745_v11 = vld [vmem:[#allocation2 + $0x8] sm:$0xff]  ;;  %v1203_v15 = vld [vmem:[%s2070_s13] sm:$0xff]  ;;  %v870_v25 = vadd.s32 4294967288, %v868_v18  ;;  %s2091_s26 = sld [smem:[#allocation15_spill]]  ;;  %s1595_s4 = smov [#allocation5]  }
  0x22   : > { %855 = vadd.xlane.f32.xlu0 %v854_v9  ;;  %v1742_v10 = vld [vmem:[#allocation3] sm:$0xff]  ;;  %841 = vmatpush.msra.mxu3 %v1745_v11  ;;  %v857_v12 = vsel %vm731_vm1, %v1745_v11, 0.0  ;;  %v671_v48 = vld [vmem:[%s2063_s6] sm:$0xff]  ;;  %s1362_s30 = sshll.u32 %s1595_s4, 4  ;;  %s1598_s4 = smov [#allocation7]   ;;  %s1363_s30 = int_to_ptr.vmem [resolvable:$true] %s1362_s30 }
  0x23   : > { %v1734_v5 = vld [vmem:[#allocation4] sm:$0xff]  ;;  %663 = vmatpush.msra.mxu0 %v1742_v10  ;;  %v1117_v16 = vsel %vm731_vm1, %v1742_v10, 0.0  ;;  %v639_v47 = vld [vmem:[%s2087_s0] sm:$0xff]  ;;  %v640_v51 = vld [vmem:[%s2087_s0 + $0x8] sm:$0xff] }
  0x24   : > { %v957_v8 = vsel %vm731_vm1, %v1734_v5, 0.0  ;;  %694 = vmatpush.msra.mxu1 %v1734_v5  ;;  %842 = vmatpush.msra.mxu3 %v1736_v6 }
  0x25   : > { %958 = vadd.xlane.f32.xlu1 %v957_v8  ;;  %949 = vmatpush.msrb.mxu0 %v1745_v11 }
  0x26   : > { %1037 = vmatpush.msrb.mxu1 %v1734_v5  ;;  %1423 = vmatmul.msk.f32.vlgmr.msra.gmra.mxu0 %vm641_vm2, %v639_v47 }
  0x27   : > { %950 = vmatpush.msrb.mxu0 %v1736_v6  ;;  %1425 = vmatmul.msk.f32.vlgmr.msra.gmra.mxu1 %vm641_vm2, %v671_v48  ;;  %v1202_v48 = vld [vmem:[%s2090_s5] sm:$0xff]  ;;  %s2092_s5 = sld [smem:[#allocation11_spill]] }
  0x28   : > { %1271 = vmatpush.msra.mxu1 %v1745_v11 }
  0x29   : > { %1197 = vmatpush.msra.mxu0 %v1742_v10 }
  0x2a   : > { %858 = vadd.xlane.f32.xlu0 %v857_v12  ;;  %1272 = vmatpush.msra.mxu1 %v1736_v6 }
  0x2e   : > { %1424 = vmatmul.msk.f32.gmra.mxu0 %vm641_vm2, %v640_v51 }
  0x2f   : > { %1426 = vmatmul.msk.f32.gmra.mxu1 %vm641_vm2, %v672_v52 }
  0x3e   : > { %862 = vperm.xlu1 %1474, %v853_v13   ;;  %1122 = vperm.xlu0 %1476, %v1116_v14  }
  0x46   : > { %1206 = vperm.xlu1 %1474, %v1203_v15   ;;  %v955_v15 = vld [vmem:[%s2088_s27] sm:$0xff]  ;;  %s1596_s27 = smov 128  }
  0x48   : > { %1118 = vadd.xlane.f32.xlu2 %v1117_v16 }
  0x79   : > { %v963_v21 = vpop.permute.xlu2 %962 }
  0x95   : > { %v856_v24 = vpop.xlane.xlu0 %855 }
  0x96   : > { %v869_v27 = vperm.slane %v856_v24, %v868_v18 }
  0x98   : > { %v959_v19 = vpop.xlane.xlu1 %958 }
  0x99   : > { %v966_v20 = vperm.slane %v959_v19, %v868_v18 }
  0x9b   : > { %v974_v22 = vmul.f32 %v966_v20, %v963_v21 }
  0x9d   : > { %v975_v23 = vsel %vm641_vm2, %v974_v22, -inf  ;;  %v859_v26 = vpop.xlane.xlu0 %858 }
  0x9e   : > { %976 = vmax.xlane.f32.xlu2 %v975_v23  ;;  %v871_v28 = vperm.slane %v859_v26, %v870_v25 }
  0xa0   : > { %v873_v30 = vsel %vm872_vm3, %v871_v28, %v869_v27 }
  0xb0   : > { %v863_v29 = vpop.permute.xlu1 %862  ;;  %v1123_v37 = vpop.permute.xlu0 %1122 }
  0xb1   : > { %v887_v31 = vmul.f32 %v873_v30, %v863_v29 }
  0xb3   : > { %v888_v32 = vsel %vm820_vm4, %v887_v31, -inf }
  0xb4   : > { %889 = vmax.xlane.f32.xlu1 %v888_v32 }
  0xb8   : > { %v1207_v33 = vpop.permute.xlu1 %1206 }
  0xb9   : > { %v1209_v34 = vmul.f32 %v1207_v33, %v873_v30 }
  0xbb   : > { %v1210_v35 = vsel %vm820_vm4, %v1209_v34, -inf  ;;  %v1119_v36 = vpop.xlane.xlu2 %1118 }
  0xbc   : > { %1211 = vmax.xlane.f32.xlu2 %v1210_v35  ;;  %v1126_v38 = vperm.slane %v1119_v36, %v868_v18  ;;  %v852_v35 = vld [vmem:[%s2089_s29] sm:$0xff] }
  0xbe   : > { %v1134_v39 = vmul.f32 %v1126_v38, %v1123_v37 }
  0xc0   : > { %v1135_v40 = vsel %vm641_vm2, %v1134_v39, -inf }
  0xc1   : > { %1136 = vmax.xlane.f32.xlu0 %v1135_v40 }
 0x111   : > { %v977_v41 = vpop.xlane.xlu2 %976 }
 0x112   : > { %v978_v42 = vsub.f32 %v974_v22, %v977_v41 }
 0x114   : > { %v979_v43 = vmul.f32 1.442695, %v978_v42  ;;  %v1811_v42 = vpop.f32.mrf.mxu1 }
 0x116   : > { %1480 = vpow2.f32 %v979_v43 }
 0x11c   : > { %v1481_v44 = vpop.eup %1480 }
 0x11d   : > { %v981_v45 = vsel %vm641_vm2, %v1481_v44, 0.0 }
 0x11e   : > { %982 = vadd.xlane.f32.xlu2 %v981_v45 }
 0x127   : > { %v890_v46 = vpop.xlane.xlu1 %889 }
 0x128   : > { %v891_v49 = vsub.f32 %v887_v31, %v890_v46  ;;  %v1815_v46 = vpop.f32.mrf.mxu0 }
 0x12a   : > { %v892_v50 = vmul.f32 1.442695, %v891_v49 }
 0x12c   : > { %1482 = vpow2.f32 %v892_v50 }
 0x12f   : > { %v1212_v53 = vpop.xlane.xlu2 %1211 }
 0x130   : > { %v1213_v54 = vsub.f32 %v1209_v34, %v1212_v53 }
 0x132   : > { %v1483_v55 = vpop.eup %1482  ;;  %v1214_v56 = vmul.f32 1.442695, %v1213_v54 }
 0x133   : > { %v894_v57 = vsel %vm820_vm4, %v1483_v55, 0.0 }
 0x134   : > { %1484 = vpow2.f32 %v1214_v56  ;;  %895 = vadd.xlane.f32.xlu2 %v894_v57  ;;  %v1137_v59 = vpop.xlane.xlu0 %1136 }
 0x135   : > { %v1138_v60 = vsub.f32 %v1134_v39, %v1137_v59 }
 0x137   : > { %v1139_v62 = vmul.f32 1.442695, %v1138_v60  ;;  %v1827_v60 = vpop.f32.mrf.mxu1 }
 0x139   : > { %1486 = vpow2.f32 %v1139_v62 }
 0x13a   : > { %v1791_v58 = vpop.eup %1484 }
 0x13b   : > { %v1216_v61 = vsel %vm820_vm4, %v1791_v58, 0.0 }
 0x13c   : > { %1217 = vadd.xlane.f32.xlu1 %v1216_v61 }
 0x13f   : > { %v1795_v63 = vpop.eup %1486 }
 0x140   : > { %v1141_v0 = vsel %vm641_vm2, %v1795_v63, 0.0 }
 0x141   : > { %1142 = vadd.xlane.f32.xlu2 %v1141_v0  ;;  %v1115_v0 = vld [vmem:[%s2091_s26] sm:$0xff]  ;;  %s1364_s26 = sshll.u32 %s2077_s20, 4  ;;  %s1365_s26 = int_to_ptr.hbm [resolvable:$true] %s1364_s26 }
 0x191   : > { %v983_v1 = vpop.xlane.xlu2 %982 }
 0x192   : > { %1488 = vrcp.f32 %v983_v1  ;;  %v995_v7 = vand.u32 2147483648, %v983_v1  ;;  %v993_v9 = vand.u32 2147483647, %v983_v1  ;;  %vm989_vm6 = vweird.f32 %v983_v1 }
 0x194   : > { %v996_v13 = vor.u32 1.1754944e-38, %v995_v7  ;;  %vm994_vm8 = vcmp.eq.f32.partialorder %v993_v9, 8.507059e+37  ;;  %v1839_v7 = vpop.f32.mrf.mxu0 }
 0x198   : > { %v1489_v2 = vpop.eup %1488 }
 0x199   : > { %v985_v3 = vmul.f32 %v1489_v2, %v983_v1  ;;  %vm990_vm5 = vweird.f32 %v1489_v2 }
 0x19a   : > { %vm991_vm7 = vmor %vm989_vm6, %vm990_vm5 }
 0x19b   : > { %v986_v4 = vsub.f32 1.0, %v985_v3 }
 0x19d   : > { %v987_v8 = vmul.f32 %v1489_v2, %v986_v4 }
 0x19f   : > { %v988_v12 = vadd.f32 %v1489_v2, %v987_v8  ;;  %v713_v8 = vld [vmem:[%s2071_s14 + $0x58] sm:$0xff] }
 0x1a0   : > { %751 = vmatpush.msra.mxu2 %v713_v8 }
 0x1a1   : > { %v992_v14 = vsel %vm991_vm7, %v1489_v2, %v988_v12  ;;  %v711_v12 = vld [vmem:[%s2071_s14 + $0x48] sm:$0xff] }
 0x1a2   : > { %v997_v16 = vsel %vm994_vm8, %v996_v13, %v992_v14  ;;  %v710_v14 = vld [vmem:[%s2071_s14 + $0x40] sm:$0xff] }
 0x1a3   : > { %v998_v17 = vmul.f32 %v1481_v44, %v997_v16  ;;  %v708_v16 = vld [vmem:[%s2071_s14 + $0x30] sm:$0xff] }
 0x1a5   : > { %v1802_v18 = vmul.f32 %v998_v17, %v955_v15  ;;  %v709_v15 = vld [vmem:[%s2071_s14 + $0x38] sm:$0xff]  ;;  %v707_v17 = vld [vmem:[%s2071_s14 + $0x28] sm:$0xff] }
 0x1a7   : > { %v896_v19 = vpop.xlane.xlu2 %895  ;;  %v1000_v20 = vsel %vm641_vm2, %v1802_v18, 0.0 }
 0x1a8   : > { %1490 = vrcp.f32 %v896_v19  ;;  %1001 = vadd.xlane.f32.xlu1 %v1000_v20  ;;  %v908_v25 = vand.u32 2147483648, %v896_v19  ;;  %v906_v27 = vand.u32 2147483647, %v896_v19  ;;  %vm902_vm10 = vweird.f32 %v896_v19 }
 0x1aa   : > { %v909_v30 = vor.u32 1.1754944e-38, %v908_v25  ;;  %vm907_vm12 = vcmp.eq.f32.partialorder %v906_v27, 8.507059e+37  ;;  %v704_v27 = vld [vmem:[%s2071_s14 + $0x10] sm:$0xff] }
 0x1ae   : > { %v1491_v21 = vpop.eup %1490 }
 0x1af   : > { %v898_v22 = vmul.f32 %v1491_v21, %v896_v19  ;;  %v1218_v23 = vpop.xlane.xlu1 %1217  ;;  %vm903_vm9 = vweird.f32 %v1491_v21 }
 0x1b0   : > { %1492 = vrcp.f32 %v1218_v23  ;;  %vm904_vm11 = vmor %vm902_vm10, %vm903_vm9  ;;  %v1230_v37 = vand.u32 2147483648, %v1218_v23  ;;  %v1228_v40 = vand.u32 2147483647, %v1218_v23  ;;  %vm1224_vm14 = vweird.f32 %v1218_v23 }
 0x1b1   : > { %v899_v24 = vsub.f32 1.0, %v898_v22 }
 0x1b2   : > { %v1231_v44 = vor.u32 1.1754944e-38, %v1230_v37  ;;  %vm1229_vm0 = vcmp.eq.f32.partialorder %v1228_v40, 8.507059e+37 }
 0x1b3   : > { %v900_v26 = vmul.f32 %v1491_v21, %v899_v24 }
 0x1b4   : > { %v1143_v38 = vpop.xlane.xlu2 %1142 }
 0x1b5   : > { %v901_v28 = vadd.f32 %v1491_v21, %v900_v26  ;;  %1494 = vrcp.f32 %v1143_v38  ;;  %v1153_v59 = vand.u32 2147483647, %v1143_v38  ;;  %vm1149_vm5 = vweird.f32 %v1143_v38 }
 0x1b6   : > { %v1493_v29 = vpop.eup %1492 }
 0x1b7   : > { %v1220_v31 = vmul.f32 %v1493_v29, %v1218_v23  ;;  %v905_v32 = vsel %vm904_vm11, %v1491_v21, %v901_v28  ;;  %vm1225_vm13 = vweird.f32 %v1493_v29  ;;  %vm1154_vm7 = vcmp.eq.f32.partialorder %v1153_v59, 8.507059e+37  ;;  %v706_v21 = vld [vmem:[%s2071_s14 + $0x20] sm:$0xff]  ;;  %v705_v23 = vld [vmem:[%s2071_s14 + $0x18] sm:$0xff] }
 0x1b8   : > { %v910_v33 = vsel %vm907_vm12, %v909_v30, %v905_v32  ;;  %vm1226_vm15 = vmor %vm1224_vm14, %vm1225_vm13  ;;  %v703_v30 = vld [vmem:[%s2071_s14 + $0x8] sm:$0xff] }
 0x1b9   : > { %v1221_v34 = vsub.f32 1.0, %v1220_v31  ;;  %v911_v36 = vmul.f32 %v1483_v55, %v910_v33  ;;  %v1155_v55 = vand.u32 2147483648, %v1143_v38  ;;  %v702_v33 = vld [vmem:[%s2071_s14] sm:$0xff] }
 0x1bb   : > { %v1222_v39 = vmul.f32 %v1493_v29, %v1221_v34  ;;  %v1809_v41 = vmul.f32 %v911_v36, %v852_v35  ;;  %v1495_v50 = vpop.eup %1494  ;;  %v1156_v61 = vor.u32 1.1754944e-38, %v1155_v55 }
 0x1bc   : > { %v1145_v52 = vmul.f32 %v1495_v50, %v1143_v38  ;;  %vm1150_vm3 = vweird.f32 %v1495_v50 }
 0x1bd   : > { %v1223_v43 = vadd.f32 %v1493_v29, %v1222_v39  ;;  %v913_v45 = vsel %vm820_vm4, %v1809_v41, 0.0  ;;  %vm1151_vm6 = vmor %vm1149_vm5, %vm1150_vm3  ;;  %v818_v39 = vld [vmem:[%s2092_s5] sm:$0xff] }
 0x1be   : > { %914 = vadd.xlane.f32.xlu2 %v913_v45  ;;  %v1146_v54 = vsub.f32 1.0, %v1145_v52  ;;  %1431 = vmatmul.msk.f32.vlgmr.msra.gmra.mxu3 %vm820_vm4, %v818_v39 }
 0x1bf   : > { %v1227_v47 = vsel %vm1226_vm15, %v1493_v29, %v1223_v43 }
 0x1c0   : > { %v1232_v49 = vsel %vm1229_vm0, %v1231_v44, %v1227_v47  ;;  %v1147_v57 = vmul.f32 %v1495_v50, %v1146_v54 }
 0x1c1   : > { %v1233_v51 = vmul.f32 %v1791_v58, %v1232_v49  ;;  %717 = vrot.lane.b32.xlu1 %v1815_v46, %s1593_s22 }
 0x1c2   : > { %v1148_v58 = vadd.f32 %v1495_v50, %v1147_v57 }
 0x1c3   : > { %v1823_v53 = vmul.f32 %v1233_v51, %v1202_v48  ;;  %v819_v48 = vld [vmem:[%s2092_s5 + $0x8] sm:$0xff] }
 0x1c4   : > { %v1152_v62 = vsel %vm1151_vm6, %v1495_v50, %v1148_v58  ;;  %vm734_vm6 = vcmask 523264  }
 0x1c5   : > { %v1235_v56 = vsel %vm820_vm4, %v1823_v53, 0.0  ;;  %v1157_v1 = vsel %vm1154_vm7, %v1156_v61, %v1152_v62 }
 0x1c6   : > { %1236 = vadd.xlane.f32.xlu0 %v1235_v56  ;;  %v1158_v2 = vmul.f32 %v1795_v63, %v1157_v1  ;;  %v712_v63 = vld [vmem:[%s2071_s14 + $0x50] sm:$0xff]  ;;  %1432 = vmatmul.msk.f32.gmra.mxu3 %vm820_vm4, %v819_v48 }
 0x1c7   : > { %752 = vmatpush.msra.mxu2 %v712_v63 }
 0x1c8   : > { %v1835_v3 = vmul.f32 %v1158_v2, %v1115_v0 }
 0x1c9   : > { %727 = vrot.lane.b32.xlu1 %v1827_v60, %s1594_s23  ;;  %753 = vmatpush.msra.mxu2 %v711_v12 }
 0x1ca   : > { %v1160_v4 = vsel %vm641_vm2, %v1835_v3, 0.0 }
 0x1cb   : > { %1161 = vadd.xlane.f32.xlu2 %v1160_v4  ;;  %754 = vmatpush.msra.mxu2 %v710_v14 }
 0x1cd   : > { %755 = vmatpush.msra.mxu2 %v709_v15 }
 0x1cf   : > { %756 = vmatpush.msra.mxu2 %v708_v16 }
 0x1d1   : > { %757 = vmatpush.msra.mxu2 %v707_v17 }
 0x1d3   : > { %758 = vmatpush.msra.mxu2 %v706_v21 }
 0x1d5   : > { %759 = vmatpush.msra.mxu2 %v705_v23 }
 0x1d7   : > { %760 = vmatpush.msra.mxu2 %v704_v27 }
 0x1d9   : > { %761 = vmatpush.msra.mxu2 %v703_v30 }
 0x1da   : > { %719 = vrot.lane.b32.xlu0 %v1839_v7, %s1593_s22 }
 0x1db   : > { %762 = vmatpush.msra.mxu2 %v702_v33 }
 0x1e3   : > { %725 = vrot.lane.b32.xlu2 %v1811_v42, %s1594_s23 }
 0x21b   : > { %v1002_v9 = vpop.xlane.xlu1 %1001 }
 0x21c   : > { %v1003_v13 = vadd.f32 1e-08, %v1002_v9 }
 0x21e   : > { %1496 = vrcp.f32 %v1003_v13  ;;  %v1015_v24 = vand.u32 2147483648, %v1003_v13  ;;  %v1013_v26 = vand.u32 2147483647, %v1003_v13  ;;  %vm1009_vm9 = vweird.f32 %v1003_v13 }
 0x220   : > { %v1016_v29 = vor.u32 1.1754944e-38, %v1015_v24  ;;  %vm1014_vm11 = vcmp.eq.f32.partialorder %v1013_v26, 8.507059e+37 }
 0x224   : > { %v1497_v19 = vpop.eup %1496 }
 0x225   : > { %v1005_v20 = vmul.f32 %v1497_v19, %v1003_v13  ;;  %vm1010_vm8 = vweird.f32 %v1497_v19 }
 0x226   : > { %vm1011_vm10 = vmor %vm1009_vm9, %vm1010_vm8  ;;  %vm740_vm8 = vcmask 785408  }
 0x227   : > { %v1006_v22 = vsub.f32 1.0, %v1005_v20 }
 0x229   : > { %v1007_v25 = vmul.f32 %v1497_v19, %v1006_v22 }
 0x22b   : > { %v1008_v28 = vadd.f32 %v1497_v19, %v1007_v25 }
 0x22d   : > { %v1012_v31 = vsel %vm1011_vm10, %v1497_v19, %v1008_v28 }
 0x22e   : > { %v1017_v32 = vsel %vm1014_vm11, %v1016_v29, %v1012_v31 }
 0x22f   : > { %v1018_v34 = vmul.f32 %v1017_v32, %v1802_v18 }
 0x231   : > { %1434 = vmatmul.msk.f32.vlgmr.msrb.gmra.mxu1 %vm641_vm2, %v1018_v34  ;;  %v915_v35 = vpop.xlane.xlu2 %914 }
 0x232   : > { %v916_v36 = vadd.f32 1e-08, %v915_v35 }
 0x233   : > { %v718_v62 = vpop.permute.xlu1 %717 }
 0x234   : > { %1498 = vrcp.f32 %v916_v36  ;;  %v928_v45 = vand.u32 2147483648, %v916_v36  ;;  %v926_v47 = vand.u32 2147483647, %v916_v36  ;;  %vm922_vm13 = vweird.f32 %v916_v36 }
 0x235   : > { %v732_v8 = vsel %vm731_vm1, %v1736_v6, %v718_v62 }
 0x236   : > { %v929_v52 = vor.u32 1.1754944e-38, %v928_v45  ;;  %vm927_vm15 = vcmp.eq.f32.partialorder %v926_v47, 8.507059e+37 }
 0x239   : > { %v1237_v37 = vpop.xlane.xlu0 %1236 }
 0x23a   : > { %v1238_v38 = vadd.f32 1e-08, %v1237_v37  ;;  %v1499_v40 = vpop.eup %1498 }
 0x23b   : > { %v918_v43 = vmul.f32 %v1499_v40, %v916_v36  ;;  %vm923_vm12 = vweird.f32 %v1499_v40  ;;  %v728_v20 = vpop.permute.xlu1 %727 }
 0x23c   : > { %1500 = vrcp.f32 %v1238_v38  ;;  %vm924_vm14 = vmor %vm922_vm13, %vm923_vm12  ;;  %v1250_v58 = vand.u32 2147483648, %v1238_v38  ;;  %v1248_v1 = vand.u32 2147483647, %v1238_v38  ;;  %vm1244_vm3 = vweird.f32 %v1238_v38 }
 0x23d   : > { %v919_v44 = vsub.f32 1.0, %v918_v43 }
 0x23e   : > { %v1162_v54 = vpop.xlane.xlu2 %1161  ;;  %v1251_v4 = vor.u32 1.1754944e-38, %v1250_v58  ;;  %vm1249_vm7 = vcmp.eq.f32.partialorder %v1248_v1, 8.507059e+37  ;;  %v1050_v58 = vld [vmem:[%s2073_s16 + $0x40] sm:$0xff] }
 0x23f   : > { %v920_v18 = vmul.f32 %v1499_v40, %v919_v44  ;;  %v1163_v57 = vadd.f32 1e-08, %v1162_v54 }
 0x241   : > { %v921_v50 = vadd.f32 %v1499_v40, %v920_v18  ;;  %1502 = vrcp.f32 %v1163_v57  ;;  %v1175_v21 = vand.u32 2147483648, %v1163_v57  ;;  %v1173_v23 = vand.u32 2147483647, %v1163_v57 }
 0x242   : > { %v1501_v49 = vpop.eup %1500  ;;  %vm1169_vm10 = vweird.f32 %v1163_v57 }
 0x243   : > { %v1240_v51 = vmul.f32 %v1501_v49, %v1238_v38  ;;  %v925_v55 = vsel %vm924_vm14, %v1499_v40, %v921_v50  ;;  %vm1245_vm0 = vweird.f32 %v1501_v49  ;;  %vm1174_vm12 = vcmp.eq.f32.partialorder %v1173_v23, 8.507059e+37  ;;  %v1053_v50 = vld [vmem:[%s2073_s16 + $0x58] sm:$0xff] }
 0x244   : > { %v930_v59 = vsel %vm927_vm15, %v929_v52, %v925_v55  ;;  %vm1246_vm5 = vmor %vm1244_vm3, %vm1245_vm0  ;;  %1075 = vmatpush.msrb.mxu3 %v1053_v50  ;;  %v1051_v55 = vld [vmem:[%s2073_s16 + $0x48] sm:$0xff] }
 0x245   : > { %v1241_v56 = vsub.f32 1.0, %v1240_v51  ;;  %v931_v61 = vmul.f32 %v930_v59, %v1809_v41  ;;  %v1052_v51 = vld [vmem:[%s2073_s16 + $0x50] sm:$0xff] }
 0x246   : > { %v726_v9 = vpop.permute.xlu2 %725  ;;  %1076 = vmatpush.msrb.mxu3 %v1052_v51 }
 0x247   : > { %v1242_v0 = vmul.f32 %v1501_v49, %v1241_v56  ;;  %1433 = vmatmul.msk.f32.vlgmr.msrb.gmra.mxu0 %vm820_vm4, %v931_v61  ;;  %v1503_v12 = vpop.eup %1502  ;;  %v735_v13 = vsel %vm734_vm6, %v732_v8, %v726_v9 }
 0x248   : > { %v1165_v16 = vmul.f32 %v1503_v12, %v1163_v57  ;;  %1427 = vmatmul.msk.f32.vlgmr.msra.gmra.mxu2 %vm740_vm8, %v735_v13  ;;  %vm1170_vm9 = vweird.f32 %v1503_v12  ;;  %v1288_v57 = vld [vmem:[%s2075_s18 + $0x58] sm:$0xff]  ;;  %1077 = vmatpush.msrb.mxu3 %v1051_v55 }
 0x249   : > { %v1243_v2 = vadd.f32 %v1501_v49, %v1242_v0  ;;  %vm1171_vm11 = vmor %vm1169_vm10, %vm1170_vm9  ;;  %1310 = vmatpush.msrb.mxu2 %v1288_v57 }
 0x24a   : > { %v1166_v17 = vsub.f32 1.0, %v1165_v16  ;;  %1078 = vmatpush.msrb.mxu3 %v1050_v58 }
 0x24b   : > { %v1247_v63 = vsel %vm1246_vm5, %v1501_v49, %v1243_v2 }
 0x24c   : > { %v1252_v41 = vsel %vm1249_vm7, %v1251_v4, %v1247_v63  ;;  %v720_v15 = vpop.permute.xlu0 %719  ;;  %v1167_v22 = vmul.f32 %v1503_v12, %v1166_v17  ;;  %v1049_v4 = vld [vmem:[%s2073_s16 + $0x38] sm:$0xff] }
 0x24d   : > { %v1253_v14 = vmul.f32 %v1252_v41, %v1823_v53  ;;  %v733_v19 = vsel %vm731_vm1, %v1745_v11, %v720_v15  ;;  %v1176_v53 = vor.u32 1.1754944e-38, %v1175_v21  ;;  %v844_v41 = vpop.f32.mrf.mxu3  ;;  %1079 = vmatpush.msrb.mxu3 %v1049_v4 }
 0x24e   : > { %v736_v24 = vsel %vm734_vm6, %v733_v19, %v728_v20  ;;  %v1168_v25 = vadd.f32 %v1503_v12, %v1167_v22  ;;  %v1046_v20 = vld [vmem:[%s2073_s16 + $0x20] sm:$0xff]  ;;  %v1045_v22 = vld [vmem:[%s2073_s16 + $0x18] sm:$0xff] }
 0x24f   : > { %1438 = vmatmul.msk.f32.vlgmr.msra.gmra.mxu1 %vm820_vm4, %v1253_v14 }
 0x250   : > { %1428 = vmatmul.msk.f32.gmra.mxu2 %vm740_vm8, %v736_v24  ;;  %v1172_v26 = vsel %vm1171_vm11, %v1503_v12, %v1168_v25  ;;  %v1048_v12 = vld [vmem:[%s2073_s16 + $0x30] sm:$0xff] }
 0x251   : > { %v1177_v27 = vsel %vm1174_vm12, %v1176_v53, %v1172_v26  ;;  %1080 = vmatpush.msrb.mxu3 %v1048_v12  ;;  %v1044_v25 = vld [vmem:[%s2073_s16 + $0x10] sm:$0xff] }
 0x252   : > { %v1178_v28 = vmul.f32 %v1177_v27, %v1835_v3  ;;  %v1477_v3 = vld [vmem:[%s2072_s15] ss:$0 sm:$0xff] }
 0x254   : > { %1437 = vmatmul.msk.f32.vlgmr.msra.gmra.mxu0 %vm641_vm2, %v1178_v28 }
 0x255   : > { %v847_v27 = vpop.f32.mrf.mxu3 }
 0x2ae   : > { %v1905_v29 = vpop.f32.mrf.mxu1 }
 0x2af   : > { %1060 = vrot.lane.b32.xlu2 %v1905_v29, %s1594_s23 }
 0x2c4   : > { %v1909_v30 = vpop.f32.mrf.mxu0 }
 0x2c5   : > { %1056 = vrot.lane.b32.xlu0 %v1909_v30, %s1593_s22 }
 0x2cb   : > { %v764_v32 = vpop.f32.mrf.mxu2 }
 0x2cc   : > { %v1913_v31 = vpop.f32.mrf.mxu1  ;;  %v765_v33 = vadd.f32 %v1477_v3, %v764_v32  ;;  %v1286_v32 = vld [vmem:[%s2075_s18 + $0x48] sm:$0xff] }
 0x2cd   : > { %1295 = vrot.lane.b32.xlu0 %v1913_v31, %s1594_s23  ;;  %s1597_s23 = smov 8  }
 0x2ce   : > { %v1429_v34 = vmul.f32 -1.442695, %v765_v33  ;;  %v1285_v33 = vld [vmem:[%s2075_s18 + $0x40] sm:$0xff] }
 0x2d0   : > { %1504 = vpow2.f32 %v1429_v34  ;;  %v1284_v34 = vld [vmem:[%s2075_s18 + $0x38] sm:$0xff] }
 0x2d1   : > { %v1920_v35 = vpop.f32.mrf.mxu0 }
 0x2d2   : > { %1291 = vrot.lane.b32.xlu1 %v1920_v35, %s1593_s22 }
 0x2d3   : > { %v767_v36 = vpop.f32.mrf.mxu2 }
 0x2d4   : > { %v768_v37 = vadd.f32 %v1477_v3, %v767_v36  ;;  %v1283_v36 = vld [vmem:[%s2075_s18 + $0x30] sm:$0xff] }
 0x2d6   : > { %v1505_v38 = vpop.eup %1504  ;;  %v1430_v39 = vmul.f32 -1.442695, %v768_v37  ;;  %v1282_v37 = vld [vmem:[%s2075_s18 + $0x28] sm:$0xff] }
 0x2d7   : > { %v776_v40 = vadd.f32 1.0, %v1505_v38  ;;  %v1281_v38 = vld [vmem:[%s2075_s18 + $0x20] sm:$0xff] }
 0x2d8   : > { %1506 = vpow2.f32 %v1430_v39  ;;  %v1280_v39 = vld [vmem:[%s2075_s18 + $0x18] sm:$0xff] }
 0x2d9   : > { %1508 = vrcp.f32 %v776_v40  ;;  %v789_v47 = vand.u32 2147483648, %v776_v40  ;;  %vm783_vm2 = vweird.f32 %v776_v40  ;;  %v787_v49 = vand.u32 2147483647, %v776_v40 }
 0x2db   : > { %v790_v54 = vor.u32 1.1754944e-38, %v789_v47  ;;  %vm788_vm14 = vcmp.eq.f32.partialorder %v787_v49, 8.507059e+37 }
 0x2de   : > { %v1507_v43 = vpop.eup %1506 }
 0x2df   : > { %v1509_v44 = vpop.eup %1508  ;;  %v777_v45 = vadd.f32 1.0, %v1507_v43  ;;  %v1278_v43 = vld [vmem:[%s2075_s18 + $0x8] sm:$0xff] }
 0x2e0   : > { %v779_v18 = vmul.f32 %v1509_v44, %v776_v40  ;;  %vm784_vm4 = vweird.f32 %v1509_v44  ;;  %v1279_v40 = vld [vmem:[%s2075_s18 + $0x10] sm:$0xff] }
 0x2e1   : > { %1510 = vrcp.f32 %v777_v45  ;;  %vm785_vm13 = vmor %vm783_vm2, %vm784_vm4  ;;  %vm798_vm15 = vweird.f32 %v777_v45  ;;  %v802_v1 = vand.u32 2147483647, %v777_v45  ;;  %v804_v2 = vand.u32 2147483648, %v777_v45 }
 0x2e2   : > { %v780_v48 = vsub.f32 1.0, %v779_v18 }
 0x2e3   : > { %v805_v16 = vor.u32 1.1754944e-38, %v804_v2  ;;  %vm803_vm5 = vcmp.eq.f32.partialorder %v802_v1, 8.507059e+37 }
 0x2e4   : > { %v781_v52 = vmul.f32 %v1509_v44, %v780_v48 }
 0x2e6   : > { %v782_v56 = vadd.f32 %v1509_v44, %v781_v52 }
 0x2e7   : > { %v1511_v59 = vpop.eup %1510 }
 0x2e8   : > { %v794_v61 = vmul.f32 %v1511_v59, %v777_v45  ;;  %v786_v62 = vsel %vm785_vm13, %v1509_v44, %v782_v56  ;;  %vm799_vm0 = vweird.f32 %v1511_v59  ;;  %v1277_v44 = vld [vmem:[%s2075_s18] sm:$0xff] }
 0x2e9   : > { %v791_v0 = vsel %vm788_vm14, %v790_v54, %v786_v62  ;;  %vm800_vm3 = vmor %vm798_vm15, %vm799_vm0  ;;  %v1478_v54 = vld [vmem:[%s2074_s17] ss:$0 sm:$0xff] }
 0x2ea   : > { %v795_v8 = vsub.f32 1.0, %v794_v61  ;;  %v808_v63 = vmul.f32 %v791_v0, %v1815_v46  ;;  %v812_v9 = vsub.f32 1.0, %v791_v0  ;;  %v1047_v46 = vld [vmem:[%s2073_s16 + $0x28] sm:$0xff]  ;;  %v1479_v61 = vld [vmem:[%s2076_s19] ss:$0 sm:$0xff] }
 0x2eb   : > { %1081 = vmatpush.msrb.mxu3 %v1047_v46 }
 0x2ec   : > { %v810_v13 = vadd.f32 %v808_v63, %v1736_v6  ;;  %v814_v14 = vmul.f32 %v812_v9, %v1811_v42  ;;  %v796_v15 = vmul.f32 %v1511_v59, %v795_v8 }
 0x2ed   : > { %1082 = vmatpush.msrb.mxu3 %v1046_v20 }
 0x2ee   : > { %v816_v17 = vadd.f32 %v814_v14, %v810_v13  ;;  %v797_v19 = vadd.f32 %v1511_v59, %v796_v15 }
 0x2ef   : > { %1083 = vmatpush.msrb.mxu3 %v1045_v22 }
 0x2f0   : > { %v850_v6 = vadd.f32 %v844_v41, %v816_v17  ;;  %v801_v21 = vsel %vm800_vm3, %v1511_v59, %v797_v19 }
 0x2f1   : > { %v806_v42 = vsel %vm803_vm5, %v805_v16, %v801_v21  ;;  %1084 = vmatpush.msrb.mxu3 %v1044_v25 }
 0x2f2   : > { %1350 = vst.msk [vmem:[#allocation2] sm:$0xff] %vm731_vm1, %v850_v6  ;;  %v809_v23 = vmul.f32 %v806_v42, %v1839_v7  ;;  %v813_v24 = vsub.f32 1.0, %v806_v42  ;;  %v1043_v7 = vld [vmem:[%s2073_s16 + $0x8] sm:$0xff] }
 0x2f3   : > { %1354 = vst.msk [vmem:[#allocation5] sm:$0xff] %vm731_vm1, %v850_v6  ;;  %1085 = vmatpush.msrb.mxu3 %v1043_v7 }
 0x2f4   : > { %v811_v53 = vadd.f32 %v809_v23, %v1745_v11  ;;  %v815_v26 = vmul.f32 %v813_v24, %v1827_v60  ;;  %v1287_v11 = vld [vmem:[%s2075_s18 + $0x50] sm:$0xff]  ;;  %v1042_v60 = vld [vmem:[%s2073_s16] sm:$0xff] }
 0x2f5   : > { %1311 = vmatpush.msrb.mxu2 %v1287_v11  ;;  %1086 = vmatpush.msrb.mxu3 %v1042_v60 }
 0x2f6   : > { %v817_v28 = vadd.f32 %v815_v26, %v811_v53 }
 0x2f7   : > { %1312 = vmatpush.msrb.mxu2 %v1286_v32 }
 0x2f8   : > { %v851_v3 = vadd.f32 %v847_v27, %v817_v28 }
 0x2f9   : > { %1313 = vmatpush.msrb.mxu2 %v1285_v33 }
 0x2fa   : > { %1351 = vst.msk [vmem:[#allocation2 + $0x8] sm:$0xff] %vm731_vm1, %v851_v3 }
 0x2fb   : > { %1355 = vst.msk [vmem:[#allocation5 + $0x8] sm:$0xff] %vm731_vm1, %v851_v3  ;;  %1314 = vmatpush.msrb.mxu2 %v1284_v34 }
 0x2fc   : > { %1448 = dma.vmem_to_hbm [thread:$0]  (%p2017_p4), %s1363_s30, 256, %s1365_s26, [#allocation6], %s1596_s27, %s1596_s27, %s1597_s23  }
 0x2fd   : > { %1315 = vmatpush.msrb.mxu2 %v1283_v36  ;;  %s1377_s30 = sshll.u32 %s1598_s4, 4  ;;  %s1379_s26 = sshll.u32 %s2078_s21, 4  ;;  %s1378_s30 = int_to_ptr.vmem [resolvable:$true] %s1377_s30  ;;  %s1380_s26 = int_to_ptr.hbm [resolvable:$true] %s1379_s26 }
 0x2ff   : > { %1316 = vmatpush.msrb.mxu2 %v1282_v37 }
 0x301   : > { %1317 = vmatpush.msrb.mxu2 %v1281_v38 }
 0x303   : > { %1318 = vmatpush.msrb.mxu2 %v1280_v39 }
 0x305   : > { %1319 = vmatpush.msrb.mxu2 %v1279_v40 }
 0x307   : > { %1320 = vmatpush.msrb.mxu2 %v1278_v43 }
 0x309   : > { %1321 = vmatpush.msrb.mxu2 %v1277_v44  ;;  %v1061_v18 = vpop.permute.xlu2 %1060 }
 0x337   : > { %v1057_v45 = vpop.permute.xlu0 %1056 }
 0x338   : > { %v1063_v47 = vsel %vm731_vm1, %v1742_v10, %v1057_v45 }
 0x339   : > { %v1064_v48 = vsel %vm734_vm6, %v1063_v47, %v1061_v18 }
 0x33a   : > { %1435 = vmatmul.msk.f32.vlgmr.msrb.gmra.mxu3 %vm740_vm8, %v1064_v48 }
 0x33f   : > { %v1296_v50 = vpop.permute.xlu0 %1295 }
 0x344   : > { %v1292_v49 = vpop.permute.xlu1 %1291 }
 0x345   : > { %v1298_v51 = vsel %vm731_vm1, %v1734_v5, %v1292_v49 }
 0x346   : > { %v1299_v52 = vsel %vm734_vm6, %v1298_v51, %v1296_v50 }
 0x347   : > { %1439 = vmatmul.msk.f32.vlgmr.msrb.gmra.mxu2 %vm740_vm8, %v1299_v52 }
 0x3bd   : > { %v1088_v55 = vpop.f32.mrf.mxu3 }
 0x3be   : > { %v1089_v56 = vadd.f32 %v1478_v54, %v1088_v55 }
 0x3c0   : > { %v1436_v57 = vmul.f32 -1.442695, %v1089_v56 }
 0x3c2   : > { %1512 = vpow2.f32 %v1436_v57 }
 0x3c8   : > { %v1513_v59 = vpop.eup %1512 }
 0x3c9   : > { %v1094_v58 = vadd.f32 1.0, %v1513_v59 }
 0x3ca   : > { %v1323_v62 = vpop.f32.mrf.mxu2 }
 0x3cb   : > { %1514 = vrcp.f32 %v1094_v58  ;;  %v1324_v0 = vadd.f32 %v1479_v61, %v1323_v62  ;;  %v1106_v63 = vand.u32 2147483648, %v1094_v58  ;;  %v1104_v41 = vand.u32 2147483647, %v1094_v58 }
 0x3cc   : > { %vm1100_vm7 = vweird.f32 %v1094_v58 }
 0x3cd   : > { %v1440_v4 = vmul.f32 -1.442695, %v1324_v0  ;;  %v1107_v13 = vor.u32 1.1754944e-38, %v1106_v63  ;;  %vm1105_vm9 = vcmp.eq.f32.partialorder %v1104_v41, 8.507059e+37 }
 0x3cf   : > { %1516 = vpow2.f32 %v1440_v4 }
 0x3d1   : > { %v1515_v1 = vpop.eup %1514 }
 0x3d2   : > { %v1096_v2 = vmul.f32 %v1515_v1, %v1094_v58  ;;  %vm1101_vm6 = vweird.f32 %v1515_v1 }
 0x3d3   : > { %vm1102_vm8 = vmor %vm1100_vm7, %vm1101_vm6 }
 0x3d4   : > { %v1097_v8 = vsub.f32 1.0, %v1096_v2 }
 0x3d5   : > { %v1517_v14 = vpop.eup %1516 }
 0x3d6   : > { %v1098_v9 = vmul.f32 %v1515_v1, %v1097_v8  ;;  %v1329_v16 = vadd.f32 1.0, %v1517_v14 }
 0x3d8   : > { %v1099_v12 = vadd.f32 %v1515_v1, %v1098_v9  ;;  %1518 = vrcp.f32 %v1329_v16  ;;  %v1341_v22 = vand.u32 2147483648, %v1329_v16  ;;  %v1339_v23 = vand.u32 2147483647, %v1329_v16 }
 0x3d9   : > { %vm1335_vm11 = vweird.f32 %v1329_v16 }
 0x3da   : > { %v1103_v15 = vsel %vm1102_vm8, %v1515_v1, %v1099_v12  ;;  %v1342_v25 = vor.u32 1.1754944e-38, %v1341_v22  ;;  %vm1340_vm2 = vcmp.eq.f32.partialorder %v1339_v23, 8.507059e+37 }
 0x3db   : > { %v1108_v46 = vsel %vm1105_vm9, %v1107_v13, %v1103_v15 }
 0x3dc   : > { %v1110_v17 = vmul.f32 %v1108_v46, %v1909_v30  ;;  %v1112_v19 = vsub.f32 1.0, %v1108_v46 }
 0x3de   : > { %v1111_v20 = vadd.f32 %v1110_v17, %v1742_v10  ;;  %v1113_v6 = vmul.f32 %v1112_v19, %v1905_v29  ;;  %v1519_v42 = vpop.eup %1518 }
 0x3df   : > { %v1331_v30 = vmul.f32 %v1519_v42, %v1329_v16  ;;  %vm1336_vm10 = vweird.f32 %v1519_v42 }
 0x3e0   : > { %v1114_v21 = vadd.f32 %v1113_v6, %v1111_v20  ;;  %vm1337_vm12 = vmor %vm1335_vm11, %vm1336_vm10 }
 0x3e1   : > { %v1332_v10 = vsub.f32 1.0, %v1331_v30 }
 0x3e2   : > { %1352 = vst.msk [vmem:[#allocation3] sm:$0xff] %vm731_vm1, %v1114_v21 }
 0x3e3   : > { %1356 = vst.msk [vmem:[#allocation7] sm:$0xff] %vm731_vm1, %v1114_v21  ;;  %v1333_v29 = vmul.f32 %v1519_v42, %v1332_v10 }
 0x3e4   : > { %1450 = dma.vmem_to_hbm [thread:$0]  (%p2017_p4), %s1378_s30, 128, %s1380_s26, [#allocation8]  }
 0x3e5   : > { %v1334_v24 = vadd.f32 %v1519_v42, %v1333_v29 }
 0x3e7   : > { %v1338_v53 = vsel %vm1337_vm12, %v1519_v42, %v1334_v24 }
 0x3e8   : > { %v1343_v26 = vsel %vm1340_vm2, %v1342_v25, %v1338_v53 }
 0x3e9   : > { %v1345_v27 = vmul.f32 %v1343_v26, %v1920_v35  ;;  %v1347_v28 = vsub.f32 1.0, %v1343_v26 }
 0x3eb   : > { %v1346_v3 = vadd.f32 %v1345_v27, %v1734_v5  ;;  %v1348_v7 = vmul.f32 %v1347_v28, %v1913_v31 }
 0x3ed   : > { %v1349_v11 = vadd.f32 %v1348_v7, %v1346_v3 }
 0x3ef   : > { %1353 = vst.msk [vmem:[#allocation4] sm:$0xff] %vm731_vm1, %v1349_v11 }
 0x3f0   : > { %1581 = dma.done.wait (%p2017_p4), [#allocation6], 256  }
 0x3f1   : > { %1583 = vsyncadd (%p2017_p4), [#allocation6], 4294967040 }
 0x3f2   : > { %1585 = dma.done.wait (%p2017_p4), [#allocation8], 128  }
 0x3f3   : > { %1587 = vsyncadd (%p2017_p4), [#allocation8], 4294967168 }
 0x3f4 PF: > { %s34_s2 = sadd.s32 1, %s1590_s2  }
 0x3f5   : > { %p31_p5 = scmp.ge.s32.totalorder %s34_s2, 4  }
 0x3f7   :  { %33 = sbr.rel (!%p31_p5) target bundleno = 9 (0x9), region = 136 }
 0x3fc   :  { %1398 = vsyncpa [#allocation6], 1 }
 0x3fd   :  { %1400 = vsyncpa [#allocation6 + $0x1], 1 }
 0x3fe   :  { %1401 = vsyncpa [#allocation8], 1 }

</bundles_post_ra>
